<compile_context>
chip_gen: v6e
topology: v6e:2x2x1
jax: 0.10.0
libtpu: 0.0.40
codegen_flags: <defaults>
</compile_context>

<pallas_src>
import math
from functools import partial

import jax
import jax.numpy as jnp
from jax.experimental import pallas as pl
from jax.experimental.pallas import tpu as pltpu


_VMEM_LIMIT = 48 * 1024 * 1024          # explicit scoped-VMEM cap (fits v7x's 64 MiB physical)
_ROW_TILES = (512, 256, 128, 64, 32, 16, 8)   # token-row tiles (sublane axis, multiples of 8)
_COL_TILES = (512, 256, 128)                  # lane / contraction tiles (multiples of 128)
_SEQ_TILES = (256, 128, 64, 32, 16, 8)        # attention q/kv sequence tiles


def _pick_tile(dim, candidates):
    """Largest candidate that evenly divides `dim`; else the full dim (single block)."""
    for c in candidates:
        if c <= dim and dim % c == 0:
            return c
    return dim


# ----------------------------- Pallas kernels ------------------------------

def _norm_matmul_kernel(eps, x_ref, w_ref, o_ref):
    x = x_ref[...]                                       # f32 (tm, D)
    ms = jnp.mean(x * x, axis=-1, keepdims=True)         # norm math stays f32 (v5e: no bf16 VPU/EUP)
    xn = (x * jax.lax.rsqrt(ms + eps)).astype(jnp.bfloat16)
    o_ref[...] = jnp.dot(xn, w_ref[...], preferred_element_type=jnp.float32)


def rmsnorm_matmul(x, w_bf16, eps):
    """Fused RMSNorm (gamma pre-folded into w) + matmul, tiled over rows and output cols."""
    M, D = x.shape
    Dout = w_bf16.shape[1]
    tm = _pick_tile(M, _ROW_TILES)
    tn = _pick_tile(Dout, _COL_TILES)
    return pl.pallas_call(
        partial(_norm_matmul_kernel, eps),
        grid=(M // tm, Dout // tn),
        in_specs=[pl.BlockSpec((tm, D), lambda i, j: (i, 0)),
                  pl.BlockSpec((D, tn), lambda i, j: (0, j))],
        out_specs=pl.BlockSpec((tm, tn), lambda i, j: (i, j)),
        out_shape=jax.ShapeDtypeStruct((M, Dout), jnp.float32),
        compiler_params=pltpu.CompilerParams(
            dimension_semantics=("parallel", "parallel"),
            vmem_limit_bytes=_VMEM_LIMIT),
    )(x, w_bf16)


def _matmul_resid_kernel(x_ref, w_ref, r_ref, o_ref, acc_ref):
    k = pl.program_id(2)

    @pl.when(k == 0)
    def _():
        acc_ref[...] = jnp.zeros_like(acc_ref)

    acc_ref[...] += jnp.dot(x_ref[...].astype(jnp.bfloat16), w_ref[...],
                            preferred_element_type=jnp.float32)

    @pl.when(k == pl.num_programs(2) - 1)
    def _():
        o_ref[...] = r_ref[...] + acc_ref[...]           # fused residual add


def matmul_residual(x, w_bf16, residual):
    """out = residual + x @ w, tiled (rows, out-cols, K-reduction) with f32 accumulator."""
    M, K = x.shape
    Dout = w_bf16.shape[1]
    tm = _pick_tile(M, _ROW_TILES)
    tn = _pick_tile(Dout, _COL_TILES)
    tk = _pick_tile(K, _COL_TILES)
    return pl.pallas_call(
        _matmul_resid_kernel,
        grid=(M // tm, Dout // tn, K // tk),
        in_specs=[pl.BlockSpec((tm, tk), lambda i, j, k: (i, k)),
                  pl.BlockSpec((tk, tn), lambda i, j, k: (k, j)),
                  pl.BlockSpec((tm, tn), lambda i, j, k: (i, j))],
        out_specs=pl.BlockSpec((tm, tn), lambda i, j, k: (i, j)),
        out_shape=jax.ShapeDtypeStruct((M, Dout), jnp.float32),
        scratch_shapes=[pltpu.VMEM((tm, tn), jnp.float32)],
        compiler_params=pltpu.CompilerParams(
            dimension_semantics=("parallel", "parallel", "arbitrary"),
            vmem_limit_bytes=_VMEM_LIMIT),
    )(x, w_bf16, residual)


def _swiglu_ffn_kernel(eps, x_ref, w1_ref, w3_ref, w2_ref, o_ref, acc_ref):
    k = pl.program_id(1)

    @pl.when(k == 0)
    def _():
        acc_ref[...] = jnp.zeros_like(acc_ref)

    x = x_ref[...]                                       # f32 (tm, D), also the residual
    ms = jnp.mean(x * x, axis=-1, keepdims=True)
    xn = (x * jax.lax.rsqrt(ms + eps)).astype(jnp.bfloat16)
    h1 = jnp.dot(xn, w1_ref[...], preferred_element_type=jnp.float32)
    h3 = jnp.dot(xn, w3_ref[...], preferred_element_type=jnp.float32)
    sig = pl.reciprocal(1.0 + jnp.exp(-h1), approx=True)  # silu via EUP exp + rcp (free slots)
    g = (h1 * sig) * h3
    acc_ref[...] += jnp.dot(g.astype(jnp.bfloat16), w2_ref[...],
                            preferred_element_type=jnp.float32)

    @pl.when(k == pl.num_programs(1) - 1)
    def _():
        o_ref[...] = x + acc_ref[...]                    # fused residual add


def swiglu_ffn(x, w1_bf16, w3_bf16, w2_bf16, eps):
    """out = x + W2( silu(norm(x) W1) * (norm(x) W3) ), hidden dim is the reduction axis."""
    M, D = x.shape
    Hd = w1_bf16.shape[1]
    tm = _pick_tile(M, _ROW_TILES)
    th = _pick_tile(Hd, _COL_TILES)
    return pl.pallas_call(
        partial(_swiglu_ffn_kernel, eps),
        grid=(M // tm, Hd // th),
        in_specs=[pl.BlockSpec((tm, D), lambda i, k: (i, 0)),
                  pl.BlockSpec((D, th), lambda i, k: (0, k)),
                  pl.BlockSpec((D, th), lambda i, k: (0, k)),
                  pl.BlockSpec((th, D), lambda i, k: (k, 0))],
        out_specs=pl.BlockSpec((tm, D), lambda i, k: (i, 0)),
        out_shape=jax.ShapeDtypeStruct((M, D), jnp.float32),
        scratch_shapes=[pltpu.VMEM((tm, D), jnp.float32)],
        compiler_params=pltpu.CompilerParams(
            dimension_semantics=("parallel", "arbitrary"),
            vmem_limit_bytes=_VMEM_LIMIT),
    )(x, w1_bf16, w3_bf16, w2_bf16)


def _flash_attn_kernel(scale, tq, tk, q_ref, k_ref, v_ref, o_ref, m_sc, l_sc, acc_sc):
    qi = pl.program_id(1)
    ki = pl.program_id(2)

    @pl.when(ki == 0)
    def _():
        m_sc[...] = jnp.full_like(m_sc, -1e30)
        l_sc[...] = jnp.zeros_like(l_sc)
        acc_sc[...] = jnp.zeros_like(acc_sc)

    # Skip KV blocks entirely above the causal diagonal (saves ~half the attention FLOPs).
    @pl.when(ki * tk <= qi * tq + (tq - 1))
    def _():
        q = q_ref[...].astype(jnp.bfloat16)              # (tq, hd)
        k = k_ref[...].astype(jnp.bfloat16)              # (tk, hd)
        s = jax.lax.dot_general(q, k, (((1,), (1,)), ((), ())),
                                preferred_element_type=jnp.float32) * scale
        rows = qi * tq + jax.lax.broadcasted_iota(jnp.int32, (tq, tk), 0)
        cols = ki * tk + jax.lax.broadcasted_iota(jnp.int32, (tq, tk), 1)
        s = jnp.where(cols <= rows, s, -1e30)            # causal mask (finite: no inf-inf NaNs)
        m_prev = m_sc[...]
        m_new = jnp.maximum(m_prev, jnp.max(s, axis=-1, keepdims=True))
        alpha = jnp.exp(m_prev - m_new)
        p = jnp.exp(s - m_new)
        l_sc[...] = alpha * l_sc[...] + jnp.sum(p, axis=-1, keepdims=True)
        acc_sc[...] = alpha * acc_sc[...] + jnp.dot(
            p.astype(jnp.bfloat16), v_ref[...].astype(jnp.bfloat16),
            preferred_element_type=jnp.float32)
        m_sc[...] = m_new

    @pl.when(ki == pl.num_programs(2) - 1)
    def _():
        o_ref[...] = (acc_sc[...] * pl.reciprocal(l_sc[...], approx=True)
                      ).astype(o_ref.dtype)


def causal_attention(q, k, v):
    """Flash-style causal attention over (B*H, N, hd) slabs with online softmax."""
    BH, N, hd = q.shape
    scale = 1.0 / math.sqrt(hd)
    tq = _pick_tile(N, _SEQ_TILES)
    tk = _pick_tile(N, _SEQ_TILES)
    # TODO(synk): for real configs (hd=64..128, H>=8) batch several heads per block so the
    # lane dim is >=128 (lane-dense stores) instead of one hd-wide head per grid step.
    q_spec = pl.BlockSpec((None, tq, hd), lambda b, qi, ki: (b, qi, 0))
    kv_spec = pl.BlockSpec((None, tk, hd), lambda b, qi, ki: (b, ki, 0))
    return pl.pallas_call(
        partial(_flash_attn_kernel, scale, tq, tk),
        grid=(BH, N // tq, N // tk),
        in_specs=[q_spec, kv_spec, kv_spec],
        out_specs=pl.BlockSpec((None, tq, hd), lambda b, qi, ki: (b, qi, 0)),
        out_shape=jax.ShapeDtypeStruct((BH, N, hd), jnp.float32),
        scratch_shapes=[pltpu.VMEM((tq, 1), jnp.float32),
                        pltpu.VMEM((tq, 1), jnp.float32),
                        pltpu.VMEM((tq, hd), jnp.float32)],
        compiler_params=pltpu.CompilerParams(
            dimension_semantics=("parallel", "parallel", "arbitrary"),
            vmem_limit_bytes=_VMEM_LIMIT),
    )(q, k, v)


# ----------------------------- JAX glue -------------------------------------

def find_multiple(n, k):
    return n if n % k == 0 else n + k - n % k


def precompute_freqs_cis_2d(grid_size, n_elem, base=10000, cls_token_num=1):
    half_dim = n_elem // 2
    idx = jnp.arange(0, half_dim, 2)[: half_dim // 2].astype(jnp.float32)
    freqs = 1.0 / (base ** (idx / half_dim))
    t = jnp.arange(grid_size, dtype=jnp.float32)
    freqs = jnp.outer(t, freqs)                                  # (g, half_dim//2)
    hf = freqs.shape[-1]
    freqs_grid = jnp.concatenate(
        [jnp.broadcast_to(freqs[:, None, :], (grid_size, grid_size, hf)),
         jnp.broadcast_to(freqs[None, :, :], (grid_size, grid_size, hf))],
        axis=-1)                                                 # (g, g, half_dim)
    cache_grid = jnp.stack([jnp.cos(freqs_grid), jnp.sin(freqs_grid)], axis=-1)
    cache = cache_grid.reshape(grid_size * grid_size, half_dim, 2)
    return jnp.concatenate(
        [jnp.zeros((cls_token_num, half_dim, 2), jnp.float32), cache], axis=0)


def apply_rotary(x, cos, sin):
    # x: (B, N, H, hd); cos/sin: (N, hd//2); consecutive-pair rotary (torch view(...,-1,2))
    B, N, H, hd = x.shape
    xr = x.reshape(B, N, H, hd // 2, 2)
    x0, x1 = xr[..., 0], xr[..., 1]
    c = cos[None, :, None, :]
    s = sin[None, :, None, :]
    o0 = x0 * c - x1 * s
    o1 = x1 * c + x0 * s
    return jnp.stack([o0, o1], axis=-1).reshape(B, N, H, hd)


def transformer_block(cfg, p, x, cos, sin):
    B, N, D = x.shape
    H = cfg["n_head"]
    hd = D // H
    eps = cfg["norm_eps"]
    x2d = x.reshape(B * N, D)
    # fused attention_norm (gamma folded into weights) + wqkv   (n_kv_head == n_head)
    qkv = rmsnorm_matmul(x2d, p["wqkv_bf16"], eps).reshape(B, N, 3 * D)
    q = qkv[..., :D].reshape(B, N, H, hd)
    k = qkv[..., D:2 * D].reshape(B, N, H, hd)
    v = qkv[..., 2 * D:].reshape(B, N, H, hd)
    q = apply_rotary(q, cos, sin)
    k = apply_rotary(k, cos, sin)
    # TODO(synk): fold rotary + head split/transpose into the attention kernel's BlockSpecs
    # (lane-sliced heads) to remove these extra HBM round-trips at real model sizes.
    qh = q.transpose(0, 2, 1, 3).reshape(B * H, N, hd)
    kh = k.transpose(0, 2, 1, 3).reshape(B * H, N, hd)
    vh = v.transpose(0, 2, 1, 3).reshape(B * H, N, hd)
    attn = causal_attention(qh, kh, vh)
    attn = attn.reshape(B, H, N, hd).transpose(0, 2, 1, 3).reshape(B * N, D)
    h2d = matmul_residual(attn, p["wo_bf16"], x2d)       # x + wo(attn); dropouts = identity (eval)
    out2d = swiglu_ffn(h2d, p["w1_bf16"], p["w3_bf16"], p["w2_bf16"], eps)  # h + FFN(norm(h))
    return out2d.reshape(B, N, D)


def gpt_forward(cfg, params, idx_pre, idx_post, idx_cls):
    D = cfg["dim"]
    eps = cfg["norm_eps"]
    pre_e = params["pre_emb"][idx_pre]                       # (B, bs, D) embedding gathers: XLA
    post_e = params["post_emb"][idx_post]
    cls_e = params["class_emb"][idx_cls[:, 0]][:, None, :]   # eval: no label token-drop
    tok = pre_e + post_e
    tok = jnp.concatenate([cls_e, tok[:, :-1, :]], axis=1)
    h = tok                                                  # token_drop dropout = identity (eval)
    B, N, _ = h.shape
    freqs = params["freqs_cis"][:N]
    cos, sin = freqs[..., 0], freqs[..., 1]
    for bp in params["spatial_blocks"]:
        h = transformer_block(cfg, bp, h, cos, sin)
    # factorized context: stack [h, pre_emb(idx_pre)] along a new token axis
    fctx = jnp.stack([h, pre_e], axis=-2).reshape(B * N, 2, D)
    ff = params["freqs_cis"][:2]
    cos2, sin2 = ff[..., 0], ff[..., 1]
    for bp in params["factorized_blocks"]:
        fctx = transformer_block(cfg, bp, fctx, cos2, sin2)
    hf = fctx.reshape(B, N, 2, D)
    logits = []
    for i in range(2):
        # TODO(synk): with real 2^9-wide heads, batch both heads into one lane-dense call.
        xi = hf[:, :, i, :].reshape(B * N, D)
        li = rmsnorm_matmul(xi, params["head_bf16"][i], eps)  # fused final norm + head (gamma folded)
        logits.append(li.reshape(B, N, -1))
    return logits  # loss = None (targets not provided)


def init_params(key, cfg):
    D = cfg["dim"]
    H = cfg["n_head"]
    hd = D // H
    std = 0.02
    hidden = find_multiple(int(2 * (4 * D) / 3), cfg["multiple_of"])
    fb0, fb1 = cfg["factorized_bits"]

    def normal(k, shape):
        return std * jax.random.normal(k, shape, jnp.float32)

    n_blocks = cfg["spatial_n_layer"] + cfg["factorized_n_layer"]
    keys = jax.random.split(key, 8 + 5 * n_blocks)
    ki = iter(keys)

    def block_params():
        return dict(
            attn_norm_w=jnp.ones((D,), jnp.float32),
            ffn_norm_w=jnp.ones((D,), jnp.float32),
            wqkv_t=normal(next(ki), (D, (H + 2 * H) * hd)),   # n_kv_head = n_head
            wo_t=normal(next(ki), (D, D)),
            w1_t=normal(next(ki), (D, hidden)),
            w3_t=normal(next(ki), (D, hidden)),
            w2_t=normal(next(ki), (hidden, D)),
        )

    # NOTE: the reference inits head weights to 0 (constant_); we use small normals
    # so the output exercises the whole pipeline, still deterministic.
    return dict(
        pre_emb=normal(next(ki), (2 ** fb0, D)),
        post_emb=normal(next(ki), (2 ** fb1, D)),
        class_emb=normal(next(ki), (cfg["class_num"] + 1, D)),
        norm_w=jnp.ones((D,), jnp.float32),
        head_t=[normal(next(ki), (D, 2 ** fb0)), normal(next(ki), (D, 2 ** fb1))],
        spatial_blocks=[block_params() for _ in range(cfg["spatial_n_layer"])],
        factorized_blocks=[block_params() for _ in range(cfg["factorized_n_layer"])],
        freqs_cis=precompute_freqs_cis_2d(
            int(cfg["block_size"] ** 0.5), hd, cfg["rope_base"], cfg["cls_token_num"]),
    )


def prepare_params(raw):
    """Fold RMSNorm gammas into the downstream weights and cast all weights to bf16."""
    def fold(gamma, w_t):
        # (x*rsqrt(ms)*g) @ W  ==  (x*rsqrt(ms)) @ (g[:,None]*W)
        return (gamma[:, None] * w_t).astype(jnp.bfloat16)

    def prep_block(bp):
        return dict(
            wqkv_bf16=fold(bp["attn_norm_w"], bp["wqkv_t"]),
            wo_bf16=bp["wo_t"].astype(jnp.bfloat16),
            w1_bf16=fold(bp["ffn_norm_w"], bp["w1_t"]),
            w3_bf16=fold(bp["ffn_norm_w"], bp["w3_t"]),
            w2_bf16=bp["w2_t"].astype(jnp.bfloat16),
        )

    return dict(
        pre_emb=raw["pre_emb"],
        post_emb=raw["post_emb"],
        class_emb=raw["class_emb"],
        head_bf16=[fold(raw["norm_w"], raw["head_t"][i]) for i in range(2)],
        spatial_blocks=[prep_block(bp) for bp in raw["spatial_blocks"]],
        factorized_blocks=[prep_block(bp) for bp in raw["factorized_blocks"]],
        freqs_cis=raw["freqs_cis"],
    )


if __name__ == "__main__":
    cfg = dict(block_size=16, dim=32, n_head=4, spatial_n_layer=2,
               factorized_n_layer=2, multiple_of=16, factorized_bits=(5, 5),
               class_num=10, cls_token_num=1, norm_eps=1e-5, rope_base=10000)
    key = jax.random.PRNGKey(0)
    pk, k1, k2, k3 = jax.random.split(key, 4)
    params = prepare_params(init_params(pk, cfg))

    B = 2
    idx_pre = jax.random.randint(k1, (B, cfg["block_size"]), 0,
                                 2 ** cfg["factorized_bits"][0], dtype=jnp.int32)
    idx_post = jax.random.randint(k2, (B, cfg["block_size"]), 0,
                                  2 ** cfg["factorized_bits"][1], dtype=jnp.int32)
    idx_cls = jax.random.randint(k3, (B, 1), 0, cfg["class_num"], dtype=jnp.int32)

    fwd = jax.jit(partial(gpt_forward, cfg))
    logits = fwd(params, idx_pre, idx_post, idx_cls)
    logits = jax.block_until_ready(logits)

    assert logits[0].shape == (B, cfg["block_size"], 2 ** cfg["factorized_bits"][0])
    assert logits[1].shape == (B, cfg["block_size"], 2 ** cfg["factorized_bits"][1])
    assert all(bool(jnp.isfinite(l).all()) for l in logits)
    print("KERNEL_OK")
</pallas_src>

<mosaic_0001>
module attributes {stable_mosaic.version = 11 : i64} {
  func.func @_norm_matmul_kernel(%arg0: i32, %arg1: i32, %arg2: memref<32x32xf32, #tpu.memory_space<vmem>>, %arg3: memref<32x96xbf16, #tpu.memory_space<vmem>>, %arg4: memref<32x96xf32, #tpu.memory_space<vmem>>) attributes {dimension_semantics = [#tpu.dimension_semantics<parallel>, #tpu.dimension_semantics<parallel>], iteration_bounds = array<i64: 1, 1>, scalar_prefetch = 0 : i64, scratch_operands = 0 : i64, tpu.core_type = #tpu.core_type<tc>, window_params = [{transform_indices = @transform_0, window_bounds = array<i64: 32, 32>}, {transform_indices = @transform_1, window_bounds = array<i64: 32, 96>}, {transform_indices = @transform_2, window_bounds = array<i64: 32, 96>}]} {
    %c0 = arith.constant 0 : index
    %c0_0 = arith.constant 0 : index
    %0 = vector.load %arg2[%c0, %c0_0] : memref<32x32xf32, #tpu.memory_space<vmem>>, vector<32x32xf32>
    %1 = arith.mulf %0, %0 : vector<32x32xf32>
    %cst = arith.constant dense<0.000000e+00> : vector<32xf32>
    %2 = vector.multi_reduction <add>, %1, %cst [1] : vector<32x32xf32> to vector<32xf32>
    %3 = vector.shape_cast %2 : vector<32xf32> to vector<32x1xf32>
    %cst_1 = arith.constant 3.200000e+01 : f32
    %4 = vector.broadcast %cst_1 : f32 to vector<32x1xf32>
    %5 = arith.divf %3, %4 : vector<32x1xf32>
    %cst_2 = arith.constant 9.99999974E-6 : f32
    %6 = vector.broadcast %cst_2 : f32 to vector<32x1xf32>
    %7 = arith.addf %5, %6 : vector<32x1xf32>
    %8 = math.rsqrt %7 : vector<32x1xf32>
    %9 = vector.broadcast %8 : vector<32x1xf32> to vector<32x32xf32>
    %10 = arith.mulf %0, %9 : vector<32x32xf32>
    %11 = arith.truncf %10 : vector<32x32xf32> to vector<32x32xbf16>
    %c0_3 = arith.constant 0 : index
    %c0_4 = arith.constant 0 : index
    %12 = vector.load %arg3[%c0_3, %c0_4] : memref<32x96xbf16, #tpu.memory_space<vmem>>, vector<32x96xbf16>
    %cst_5 = arith.constant dense<0.000000e+00> : vector<32x96xf32>
    %13 = tpu.matmul %11, %12, %cst_5 {dimension_numbers = #tpu.dot_dimension_numbers<[1], [0], [0], [1], [0, 0, 1, 1], [], []>} : vector<32x32xbf16>, vector<32x96xbf16>, vector<32x96xf32> -> vector<32x96xf32>
    %c0_6 = arith.constant 0 : index
    %c0_7 = arith.constant 0 : index
    %14 = vector.load %arg4[%c0_6, %c0_7] : memref<32x96xf32, #tpu.memory_space<vmem>>, vector<32x96xf32>
    tpu.vector_store %arg4[%c0_6, %c0_7], %13 {strides = array<i32>} : memref<32x96xf32, #tpu.memory_space<vmem>>, vector<32x96xf32>,
    return
  }
  func.func @transform_0(%arg0: i32, %arg1: i32) -> (i32, i32) {
    %c0_i32 = arith.constant 0 : i32
    %c0_i32_0 = arith.constant 0 : i32
    return %arg0, %c0_i32 : i32, i32
  }
  func.func @transform_1(%arg0: i32, %arg1: i32) -> (i32, i32) {
    %c0_i32 = arith.constant 0 : i32
    %c0_i32_0 = arith.constant 0 : i32
    return %c0_i32, %arg1 : i32, i32
  }
  func.func @transform_2(%arg0: i32, %arg1: i32) -> (i32, i32) {
    %c0_i32 = arith.constant 0 : i32
    return %arg0, %arg1 : i32, i32
  }
}

module attributes {stable_mosaic.version = 11 : i64} {
  func.func @_flash_attn_kernel(%arg0: i32, %arg1: i32, %arg2: i32, %arg3: memref<1x16x8xf32, #tpu.memory_space<vmem>>, %arg4: memref<1x16x8xf32, #tpu.memory_space<vmem>>, %arg5: memref<1x16x8xf32, #tpu.memory_space<vmem>>, %arg6: memref<1x16x8xf32, #tpu.memory_space<vmem>>, %arg7: memref<16x1xf32, #tpu.memory_space<vmem>>, %arg8: memref<16x1xf32, #tpu.memory_space<vmem>>, %arg9: memref<16x8xf32, #tpu.memory_space<vmem>>) attributes {dimension_semantics = [#tpu.dimension_semantics<parallel>, #tpu.dimension_semantics<parallel>, #tpu.dimension_semantics<arbitrary>], iteration_bounds = array<i64: 8, 1, 1>, scalar_prefetch = 0 : i64, scratch_operands = 3 : i64, tpu.core_type = #tpu.core_type<tc>, window_params = [{transform_indices = @transform_0, window_bounds = array<i64: 1, 16, 8>}, {transform_indices = @transform_1, window_bounds = array<i64: 1, 16, 8>}, {transform_indices = @transform_2, window_bounds = array<i64: 1, 16, 8>}, {transform_indices = @transform_3, window_bounds = array<i64: 1, 16, 8>}]} {
    %c0_i32 = arith.constant 0 : i32
    %0 = arith.cmpi eq, %arg2, %c0_i32 : i32
    %1 = arith.extui %0 : i1 to i32
    %c0_i32_0 = arith.constant 0 : i32
    %2 = arith.cmpi ne, %1, %c0_i32_0 : i32
    scf.if %2 {
      %cst = arith.constant -1.000000e+30 : f32
      %12 = vector.broadcast %cst : f32 to vector<16x1xf32>
      %c0 = arith.constant 0 : index
      %c0_5 = arith.constant 0 : index
      %13 = vector.load %arg7[%c0, %c0_5] : memref<16x1xf32, #tpu.memory_space<vmem>>, vector<16x1xf32>
      tpu.vector_store %arg7[%c0, %c0_5], %12 {strides = array<i32>} : memref<16x1xf32, #tpu.memory_space<vmem>>, vector<16x1xf32>,
      %cst_6 = arith.constant 0.000000e+00 : f32
      %14 = vector.broadcast %cst_6 : f32 to vector<16x1xf32>
      %c0_7 = arith.constant 0 : index
      %c0_8 = arith.constant 0 : index
      %15 = vector.load %arg8[%c0_7, %c0_8] : memref<16x1xf32, #tpu.memory_space<vmem>>, vector<16x1xf32>
      tpu.vector_store %arg8[%c0_7, %c0_8], %14 {strides = array<i32>} : memref<16x1xf32, #tpu.memory_space<vmem>>, vector<16x1xf32>,
      %cst_9 = arith.constant 0.000000e+00 : f32
      %16 = vector.broadcast %cst_9 : f32 to vector<16x8xf32>
      %c0_10 = arith.constant 0 : index
      %c0_11 = arith.constant 0 : index
      %17 = vector.load %arg9[%c0_10, %c0_11] : memref<16x8xf32, #tpu.memory_space<vmem>>, vector<16x8xf32>
      tpu.vector_store %arg9[%c0_10, %c0_11], %16 {strides = array<i32>} : memref<16x8xf32, #tpu.memory_space<vmem>>, vector<16x8xf32>,
    } else {
    }
    %c16_i32 = arith.constant 16 : i32
    %3 = arith.muli %arg2, %c16_i32 : i32
    %c16_i32_1 = arith.constant 16 : i32
    %4 = arith.muli %arg1, %c16_i32_1 : i32
    %c15_i32 = arith.constant 15 : i32
    %5 = arith.addi %4, %c15_i32 : i32
    %6 = arith.cmpi sle, %3, %5 : i32
    %7 = arith.extui %6 : i1 to i32
    %c0_i32_2 = arith.constant 0 : i32
    %8 = arith.cmpi ne, %7, %c0_i32_2 : i32
    scf.if %8 {
      %c0 = arith.constant 0 : index
      %c0_5 = arith.constant 0 : index
      %c0_6 = arith.constant 0 : index
      %12 = vector.load %arg3[%c0, %c0_5, %c0_6] : memref<1x16x8xf32, #tpu.memory_space<vmem>>, vector<1x16x8xf32>
      %13 = vector.shape_cast %12 : vector<1x16x8xf32> to vector<16x8xf32>
      %14 = arith.truncf %13 : vector<16x8xf32> to vector<16x8xbf16>
      %c0_7 = arith.constant 0 : index
      %c0_8 = arith.constant 0 : index
      %c0_9 = arith.constant 0 : index
      %15 = vector.load %arg4[%c0_7, %c0_8, %c0_9] : memref<1x16x8xf32, #tpu.memory_space<vmem>>, vector<1x16x8xf32>
      %16 = vector.shape_cast %15 : vector<1x16x8xf32> to vector<16x8xf32>
      %17 = arith.truncf %16 : vector<16x8xf32> to vector<16x8xbf16>
      %cst = arith.constant dense<0.000000e+00> : vector<16x16xf32>
      %18 = tpu.matmul %14, %17, %cst {dimension_numbers = #tpu.dot_dimension_numbers<[1], [1], [0], [0], [0, 0, 1, 0], [], []>} : vector<16x8xbf16>, vector<16x8xbf16>, vector<16x16xf32> -> vector<16x16xf32>
      %cst_10 = arith.constant 0.353553385 : f32
      %19 = vector.broadcast %cst_10 : f32 to vector<16x16xf32>
      %20 = arith.mulf %18, %19 : vector<16x16xf32>
      %c16_i32_11 = arith.constant 16 : i32
      %21 = arith.muli %arg1, %c16_i32_11 : i32
      %22 = tpu.iota {dimensions = array<i32: 0>} : vector<16x16xi32>
      %23 = vector.broadcast %21 : i32 to vector<16x16xi32>
      %24 = arith.addi %23, %22 : vector<16x16xi32>
      %c16_i32_12 = arith.constant 16 : i32
      %25 = arith.muli %arg2, %c16_i32_12 : i32
      %26 = tpu.iota {dimensions = array<i32: 1>} : vector<16x16xi32>
      %27 = vector.broadcast %25 : i32 to vector<16x16xi32>
      %28 = arith.addi %27, %26 : vector<16x16xi32>
      %29 = arith.cmpi sle, %28, %24 : vector<16x16xi32>
      %cst_13 = arith.constant -1.000000e+30 : f32
      %30 = vector.broadcast %cst_13 : f32 to vector<16x16xf32>
      %31 = arith.select %29, %20, %30 : vector<16x16xi1>, vector<16x16xf32>
      %c0_14 = arith.constant 0 : index
      %c0_15 = arith.constant 0 : index
      %32 = vector.load %arg7[%c0_14, %c0_15] : memref<16x1xf32, #tpu.memory_space<vmem>>, vector<16x1xf32>
      %cst_16 = arith.constant dense<0xFF800000> : vector<16xf32>
      %33 = vector.multi_reduction <maximumf>, %31, %cst_16 [1] : vector<16x16xf32> to vector<16xf32>
      %34 = vector.shape_cast %33 : vector<16xf32> to vector<16x1xf32>
      %35 = arith.maximumf %32, %34 : vector<16x1xf32>
      %36 = arith.subf %32, %35 : vector<16x1xf32>
      %37 = math.exp %36 : vector<16x1xf32>
      %38 = vector.broadcast %35 : vector<16x1xf32> to vector<16x16xf32>
      %39 = arith.subf %31, %38 : vector<16x16xf32>
      %40 = math.exp %39 : vector<16x16xf32>
      %c0_17 = arith.constant 0 : index
      %c0_18 = arith.constant 0 : index
      %41 = vector.load %arg8[%c0_17, %c0_18] : memref<16x1xf32, #tpu.memory_space<vmem>>, vector<16x1xf32>
      %42 = arith.mulf %37, %41 : vector<16x1xf32>
      %cst_19 = arith.constant dense<0.000000e+00> : vector<16xf32>
      %43 = vector.multi_reduction <add>, %40, %cst_19 [1] : vector<16x16xf32> to vector<16xf32>
      %44 = vector.shape_cast %43 : vector<16xf32> to vector<16x1xf32>
      %45 = arith.addf %42, %44 : vector<16x1xf32>
      %c0_20 = arith.constant 0 : index
      %c0_21 = arith.constant 0 : index
      %46 = vector.load %arg8[%c0_20, %c0_21] : memref<16x1xf32, #tpu.memory_space<vmem>>, vector<16x1xf32>
      tpu.vector_store %arg8[%c0_20, %c0_21], %45 {strides = array<i32>} : memref<16x1xf32, #tpu.memory_space<vmem>>, vector<16x1xf32>,
      %c0_22 = arith.constant 0 : index
      %c0_23 = arith.constant 0 : index
      %47 = vector.load %arg9[%c0_22, %c0_23] : memref<16x8xf32, #tpu.memory_space<vmem>>, vector<16x8xf32>
      %48 = vector.broadcast %37 : vector<16x1xf32> to vector<16x8xf32>
      %49 = arith.mulf %48, %47 : vector<16x8xf32>
      %50 = arith.truncf %40 : vector<16x16xf32> to vector<16x16xbf16>
      %c0_24 = arith.constant 0 : index
      %c0_25 = arith.constant 0 : index
      %c0_26 = arith.constant 0 : index
      %51 = vector.load %arg5[%c0_24, %c0_25, %c0_26] : memref<1x16x8xf32, #tpu.memory_space<vmem>>, vector<1x16x8xf32>
      %52 = vector.shape_cast %51 : vector<1x16x8xf32> to vector<16x8xf32>
      %53 = arith.truncf %52 : vector<16x8xf32> to vector<16x8xbf16>
      %cst_27 = arith.constant dense<0.000000e+00> : vector<16x8xf32>
      %54 = tpu.matmul %50, %53, %cst_27 {dimension_numbers = #tpu.dot_dimension_numbers<[1], [0], [0], [1], [0, 0, 1, 1], [], []>} : vector<16x16xbf16>, vector<16x8xbf16>, vector<16x8xf32> -> vector<16x8xf32>
      %55 = arith.addf %49, %54 : vector<16x8xf32>
      %c0_28 = arith.constant 0 : index
      %c0_29 = arith.constant 0 : index
      %56 = vector.load %arg9[%c0_28, %c0_29] : memref<16x8xf32, #tpu.memory_space<vmem>>, vector<16x8xf32>
      tpu.vector_store %arg9[%c0_28, %c0_29], %55 {strides = array<i32>} : memref<16x8xf32, #tpu.memory_space<vmem>>, vector<16x8xf32>,
      %c0_30 = arith.constant 0 : index
      %c0_31 = arith.constant 0 : index
      %57 = vector.load %arg7[%c0_30, %c0_31] : memref<16x1xf32, #tpu.memory_space<vmem>>, vector<16x1xf32>
      tpu.vector_store %arg7[%c0_30, %c0_31], %35 {strides = array<i32>} : memref<16x1xf32, #tpu.memory_space<vmem>>, vector<16x1xf32>,
    } else {
    }
    %c0_i32_3 = arith.constant 0 : i32
    %9 = arith.cmpi eq, %arg2, %c0_i32_3 : i32
    %10 = arith.extui %9 : i1 to i32
    %c0_i32_4 = arith.constant 0 : i32
    %11 = arith.cmpi ne, %10, %c0_i32_4 : i32
    scf.if %11 {
      %c0 = arith.constant 0 : index
      %c0_5 = arith.constant 0 : index
      %12 = vector.load %arg9[%c0, %c0_5] : memref<16x8xf32, #tpu.memory_space<vmem>>, vector<16x8xf32>
      %c0_6 = arith.constant 0 : index
      %c0_7 = arith.constant 0 : index
      %13 = vector.load %arg8[%c0_6, %c0_7] : memref<16x1xf32, #tpu.memory_space<vmem>>, vector<16x1xf32>
      %14 = tpu.reciprocal %13 {approx = true} : vector<16x1xf32> -> vector<16x1xf32>
      %15 = vector.broadcast %14 : vector<16x1xf32> to vector<16x8xf32>
      %16 = arith.mulf %12, %15 : vector<16x8xf32>
      %c0_8 = arith.constant 0 : index
      %c0_9 = arith.constant 0 : index
      %c0_10 = arith.constant 0 : index
      %17 = vector.load %arg6[%c0_8, %c0_9, %c0_10] : memref<1x16x8xf32, #tpu.memory_space<vmem>>, vector<1x16x8xf32>
      %18 = vector.shape_cast %17 : vector<1x16x8xf32> to vector<16x8xf32>
      %19 = vector.shape_cast %16 : vector<16x8xf32> to vector<1x16x8xf32>
      tpu.vector_store %arg6[%c0_8, %c0_9, %c0_10], %19 {strides = array<i32>} : memref<1x16x8xf32, #tpu.memory_space<vmem>>, vector<1x16x8xf32>,
    } else {
    }
    return
  }
  func.func @transform_0(%arg0: i32, %arg1: i32, %arg2: i32) -> (i32, i32, i32) {
    %c0_i32 = arith.constant 0 : i32
    %c0_i32_0 = arith.constant 0 : i32
    return %arg0, %arg1, %c0_i32 : i32, i32, i32
  }
  func.func @transform_1(%arg0: i32, %arg1: i32, %arg2: i32) -> (i32, i32, i32) {
    %c0_i32 = arith.constant 0 : i32
    %c0_i32_0 = arith.constant 0 : i32
    return %arg0, %arg2, %c0_i32 : i32, i32, i32
  }
  func.func @transform_2(%arg0: i32, %arg1: i32, %arg2: i32) -> (i32, i32, i32) {
    %c0_i32 = arith.constant 0 : i32
    %c0_i32_0 = arith.constant 0 : i32
    return %arg0, %arg2, %c0_i32 : i32, i32, i32
  }
  func.func @transform_3(%arg0: i32, %arg1: i32, %arg2: i32) -> (i32, i32, i32) {
    %c0_i32 = arith.constant 0 : i32
    %c0_i32_0 = arith.constant 0 : i32
    return %arg0, %arg1, %c0_i32 : i32, i32, i32
  }
}

module attributes {stable_mosaic.version = 11 : i64} {
  func.func @_matmul_resid_kernel(%arg0: i32, %arg1: i32, %arg2: i32, %arg3: memref<32x32xf32, #tpu.memory_space<vmem>>, %arg4: memref<32x32xbf16, #tpu.memory_space<vmem>>, %arg5: memref<32x32xf32, #tpu.memory_space<vmem>>, %arg6: memref<32x32xf32, #tpu.memory_space<vmem>>, %arg7: memref<32x32xf32, #tpu.memory_space<vmem>>) attributes {dimension_semantics = [#tpu.dimension_semantics<parallel>, #tpu.dimension_semantics<parallel>, #tpu.dimension_semantics<arbitrary>], iteration_bounds = array<i64: 1, 1, 1>, scalar_prefetch = 0 : i64, scratch_operands = 1 : i64, tpu.core_type = #tpu.core_type<tc>, window_params = [{transform_indices = @transform_0, window_bounds = array<i64: 32, 32>}, {transform_indices = @transform_1, window_bounds = array<i64: 32, 32>}, {transform_indices = @transform_2, window_bounds = array<i64: 32, 32>}, {transform_indices = @transform_3, window_bounds = array<i64: 32, 32>}]} {
    %c0_i32 = arith.constant 0 : i32
    %0 = arith.cmpi eq, %arg2, %c0_i32 : i32
    %1 = arith.extui %0 : i1 to i32
    %c0_i32_0 = arith.constant 0 : i32
    %2 = arith.cmpi ne, %1, %c0_i32_0 : i32
    scf.if %2 {
      %cst_10 = arith.constant 0.000000e+00 : f32
      %13 = vector.broadcast %cst_10 : f32 to vector<32x32xf32>
      %c0_11 = arith.constant 0 : index
      %c0_12 = arith.constant 0 : index
      %14 = vector.load %arg7[%c0_11, %c0_12] : memref<32x32xf32, #tpu.memory_space<vmem>>, vector<32x32xf32>
      tpu.vector_store %arg7[%c0_11, %c0_12], %13 {strides = array<i32>} : memref<32x32xf32, #tpu.memory_space<vmem>>, vector<32x32xf32>,
    } else {
    }
    %c0 = arith.constant 0 : index
    %c0_1 = arith.constant 0 : index
    %3 = vector.load %arg7[%c0, %c0_1] : memref<32x32xf32, #tpu.memory_space<vmem>>, vector<32x32xf32>
    %c0_2 = arith.constant 0 : index
    %c0_3 = arith.constant 0 : index
    %4 = vector.load %arg3[%c0_2, %c0_3] : memref<32x32xf32, #tpu.memory_space<vmem>>, vector<32x32xf32>
    %5 = arith.truncf %4 : vector<32x32xf32> to vector<32x32xbf16>
    %c0_4 = arith.constant 0 : index
    %c0_5 = arith.constant 0 : index
    %6 = vector.load %arg4[%c0_4, %c0_5] : memref<32x32xbf16, #tpu.memory_space<vmem>>, vector<32x32xbf16>
    %cst = arith.constant dense<0.000000e+00> : vector<32x32xf32>
    %7 = tpu.matmul %5, %6, %cst {dimension_numbers = #tpu.dot_dimension_numbers<[1], [0], [0], [1], [0, 0, 1, 1], [], []>} : vector<32x32xbf16>, vector<32x32xbf16>, vector<32x32xf32> -> vector<32x32xf32>
    %8 = arith.addf %3, %7 : vector<32x32xf32>
    %c0_6 = arith.constant 0 : index
    %c0_7 = arith.constant 0 : index
    %9 = vector.load %arg7[%c0_6, %c0_7] : memref<32x32xf32, #tpu.memory_space<vmem>>, vector<32x32xf32>
    tpu.vector_store %arg7[%c0_6, %c0_7], %8 {strides = array<i32>} : memref<32x32xf32, #tpu.memory_space<vmem>>, vector<32x32xf32>,
    %c0_i32_8 = arith.constant 0 : i32
    %10 = arith.cmpi eq, %arg2, %c0_i32_8 : i32
    %11 = arith.extui %10 : i1 to i32
    %c0_i32_9 = arith.constant 0 : i32
    %12 = arith.cmpi ne, %11, %c0_i32_9 : i32
    scf.if %12 {
      %c0_10 = arith.constant 0 : index
      %c0_11 = arith.constant 0 : index
      %13 = vector.load %arg5[%c0_10, %c0_11] : memref<32x32xf32, #tpu.memory_space<vmem>>, vector<32x32xf32>
      %c0_12 = arith.constant 0 : index
      %c0_13 = arith.constant 0 : index
      %14 = vector.load %arg7[%c0_12, %c0_13] : memref<32x32xf32, #tpu.memory_space<vmem>>, vector<32x32xf32>
      %15 = arith.addf %13, %14 : vector<32x32xf32>
      %c0_14 = arith.constant 0 : index
      %c0_15 = arith.constant 0 : index
      %16 = vector.load %arg6[%c0_14, %c0_15] : memref<32x32xf32, #tpu.memory_space<vmem>>, vector<32x32xf32>
      tpu.vector_store %arg6[%c0_14, %c0_15], %15 {strides = array<i32>} : memref<32x32xf32, #tpu.memory_space<vmem>>, vector<32x32xf32>,
    } else {
    }
    return
  }
  func.func @transform_0(%arg0: i32, %arg1: i32, %arg2: i32) -> (i32, i32) {
    %c0_i32 = arith.constant 0 : i32
    return %arg0, %arg2 : i32, i32
  }
  func.func @transform_1(%arg0: i32, %arg1: i32, %arg2: i32) -> (i32, i32) {
    %c0_i32 = arith.constant 0 : i32
    return %arg2, %arg1 : i32, i32
  }
  func.func @transform_2(%arg0: i32, %arg1: i32, %arg2: i32) -> (i32, i32) {
    %c0_i32 = arith.constant 0 : i32
    return %arg0, %arg1 : i32, i32
  }
  func.func @transform_3(%arg0: i32, %arg1: i32, %arg2: i32) -> (i32, i32) {
    %c0_i32 = arith.constant 0 : i32
    return %arg0, %arg1 : i32, i32
  }
}

module attributes {stable_mosaic.version = 11 : i64} {
  func.func @_swiglu_ffn_kernel(%arg0: i32, %arg1: i32, %arg2: memref<32x32xf32, #tpu.memory_space<vmem>>, %arg3: memref<32x96xbf16, #tpu.memory_space<vmem>>, %arg4: memref<32x96xbf16, #tpu.memory_space<vmem>>, %arg5: memref<96x32xbf16, #tpu.memory_space<vmem>>, %arg6: memref<32x32xf32, #tpu.memory_space<vmem>>, %arg7: memref<32x32xf32, #tpu.memory_space<vmem>>) attributes {dimension_semantics = [#tpu.dimension_semantics<parallel>, #tpu.dimension_semantics<arbitrary>], iteration_bounds = array<i64: 1, 1>, scalar_prefetch = 0 : i64, scratch_operands = 1 : i64, tpu.core_type = #tpu.core_type<tc>, window_params = [{transform_indices = @transform_0, window_bounds = array<i64: 32, 32>}, {transform_indices = @transform_1, window_bounds = array<i64: 32, 96>}, {transform_indices = @transform_2, window_bounds = array<i64: 32, 96>}, {transform_indices = @transform_3, window_bounds = array<i64: 96, 32>}, {transform_indices = @transform_4, window_bounds = array<i64: 32, 32>}]} {
    %c0_i32 = arith.constant 0 : i32
    %0 = arith.cmpi eq, %arg1, %c0_i32 : i32
    %1 = arith.extui %0 : i1 to i32
    %c0_i32_0 = arith.constant 0 : i32
    %2 = arith.cmpi ne, %1, %c0_i32_0 : i32
    scf.if %2 {
      %cst_21 = arith.constant 0.000000e+00 : f32
      %36 = vector.broadcast %cst_21 : f32 to vector<32x32xf32>
      %c0_22 = arith.constant 0 : index
      %c0_23 = arith.constant 0 : index
      %37 = vector.load %arg7[%c0_22, %c0_23] : memref<32x32xf32, #tpu.memory_space<vmem>>, vector<32x32xf32>
      tpu.vector_store %arg7[%c0_22, %c0_23], %36 {strides = array<i32>} : memref<32x32xf32, #tpu.memory_space<vmem>>, vector<32x32xf32>,
    } else {
    }
    %c0 = arith.constant 0 : index
    %c0_1 = arith.constant 0 : index
    %3 = vector.load %arg2[%c0, %c0_1] : memref<32x32xf32, #tpu.memory_space<vmem>>, vector<32x32xf32>
    %4 = arith.mulf %3, %3 : vector<32x32xf32>
    %cst = arith.constant dense<0.000000e+00> : vector<32xf32>
    %5 = vector.multi_reduction <add>, %4, %cst [1] : vector<32x32xf32> to vector<32xf32>
    %6 = vector.shape_cast %5 : vector<32xf32> to vector<32x1xf32>
    %cst_2 = arith.constant 3.200000e+01 : f32
    %7 = vector.broadcast %cst_2 : f32 to vector<32x1xf32>
    %8 = arith.divf %6, %7 : vector<32x1xf32>
    %cst_3 = arith.constant 9.99999974E-6 : f32
    %9 = vector.broadcast %cst_3 : f32 to vector<32x1xf32>
    %10 = arith.addf %8, %9 : vector<32x1xf32>
    %11 = math.rsqrt %10 : vector<32x1xf32>
    %12 = vector.broadcast %11 : vector<32x1xf32> to vector<32x32xf32>
    %13 = arith.mulf %3, %12 : vector<32x32xf32>
    %14 = arith.truncf %13 : vector<32x32xf32> to vector<32x32xbf16>
    %c0_4 = arith.constant 0 : index
    %c0_5 = arith.constant 0 : index
    %15 = vector.load %arg3[%c0_4, %c0_5] : memref<32x96xbf16, #tpu.memory_space<vmem>>, vector<32x96xbf16>
    %cst_6 = arith.constant dense<0.000000e+00> : vector<32x96xf32>
    %16 = tpu.matmul %14, %15, %cst_6 {dimension_numbers = #tpu.dot_dimension_numbers<[1], [0], [0], [1], [0, 0, 1, 1], [], []>} : vector<32x32xbf16>, vector<32x96xbf16>, vector<32x96xf32> -> vector<32x96xf32>
    %c0_7 = arith.constant 0 : index
    %c0_8 = arith.constant 0 : index
    %17 = vector.load %arg4[%c0_7, %c0_8] : memref<32x96xbf16, #tpu.memory_space<vmem>>, vector<32x96xbf16>
    %cst_9 = arith.constant dense<0.000000e+00> : vector<32x96xf32>
    %18 = tpu.matmul %14, %17, %cst_9 {dimension_numbers = #tpu.dot_dimension_numbers<[1], [0], [0], [1], [0, 0, 1, 1], [], []>} : vector<32x32xbf16>, vector<32x96xbf16>, vector<32x96xf32> -> vector<32x96xf32>
    %cst_10 = arith.constant 0.000000e+00 : f32
    %19 = vector.broadcast %cst_10 : f32 to vector<32x96xf32>
    %20 = arith.subf %19, %16 : vector<32x96xf32>
    %21 = math.exp %20 : vector<32x96xf32>
    %cst_11 = arith.constant 1.000000e+00 : f32
    %22 = vector.broadcast %cst_11 : f32 to vector<32x96xf32>
    %23 = arith.addf %22, %21 : vector<32x96xf32>
    %24 = tpu.reciprocal %23 {approx = true} : vector<32x96xf32> -> vector<32x96xf32>
    %25 = arith.mulf %16, %24 : vector<32x96xf32>
    %26 = arith.mulf %25, %18 : vector<32x96xf32>
    %c0_12 = arith.constant 0 : index
    %c0_13 = arith.constant 0 : index
    %27 = vector.load %arg7[%c0_12, %c0_13] : memref<32x32xf32, #tpu.memory_space<vmem>>, vector<32x32xf32>
    %28 = arith.truncf %26 : vector<32x96xf32> to vector<32x96xbf16>
    %c0_14 = arith.constant 0 : index
    %c0_15 = arith.constant 0 : index
    %29 = vector.load %arg5[%c0_14, %c0_15] : memref<96x32xbf16, #tpu.memory_space<vmem>>, vector<96x32xbf16>
    %cst_16 = arith.constant dense<0.000000e+00> : vector<32x32xf32>
    %30 = tpu.matmul %28, %29, %cst_16 {dimension_numbers = #tpu.dot_dimension_numbers<[1], [0], [0], [1], [0, 0, 1, 1], [], []>} : vector<32x96xbf16>, vector<96x32xbf16>, vector<32x32xf32> -> vector<32x32xf32>
    %31 = arith.addf %27, %30 : vector<32x32xf32>
    %c0_17 = arith.constant 0 : index
    %c0_18 = arith.constant 0 : index
    %32 = vector.load %arg7[%c0_17, %c0_18] : memref<32x32xf32, #tpu.memory_space<vmem>>, vector<32x32xf32>
    tpu.vector_store %arg7[%c0_17, %c0_18], %31 {strides = array<i32>} : memref<32x32xf32, #tpu.memory_space<vmem>>, vector<32x32xf32>,
    %c0_i32_19 = arith.constant 0 : i32
    %33 = arith.cmpi eq, %arg1, %c0_i32_19 : i32
    %34 = arith.extui %33 : i1 to i32
    %c0_i32_20 = arith.constant 0 : i32
    %35 = arith.cmpi ne, %34, %c0_i32_20 : i32
    scf.if %35 {
      %c0_21 = arith.constant 0 : index
      %c0_22 = arith.constant 0 : index
      %36 = vector.load %arg7[%c0_21, %c0_22] : memref<32x32xf32, #tpu.memory_space<vmem>>, vector<32x32xf32>
      %37 = arith.addf %3, %36 : vector<32x32xf32>
      %c0_23 = arith.constant 0 : index
      %c0_24 = arith.constant 0 : index
      %38 = vector.load %arg6[%c0_23, %c0_24] : memref<32x32xf32, #tpu.memory_space<vmem>>, vector<32x32xf32>
      tpu.vector_store %arg6[%c0_23, %c0_24], %37 {strides = array<i32>} : memref<32x32xf32, #tpu.memory_space<vmem>>, vector<32x32xf32>,
    } else {
    }
    return
  }
  func.func @transform_0(%arg0: i32, %arg1: i32) -> (i32, i32) {
    %c0_i32 = arith.constant 0 : i32
    %c0_i32_0 = arith.constant 0 : i32
    return %arg0, %c0_i32 : i32, i32
  }
  func.func @transform_1(%arg0: i32, %arg1: i32) -> (i32, i32) {
    %c0_i32 = arith.constant 0 : i32
    %c0_i32_0 = arith.constant 0 : i32
    return %c0_i32, %arg1 : i32, i32
  }
  func.func @transform_2(%arg0: i32, %arg1: i32) -> (i32, i32) {
    %c0_i32 = arith.constant 0 : i32
    %c0_i32_0 = arith.constant 0 : i32
    return %c0_i32, %arg1 : i32, i32
  }
  func.func @transform_3(%arg0: i32, %arg1: i32) -> (i32, i32) {
    %c0_i32 = arith.constant 0 : i32
    %c0_i32_0 = arith.constant 0 : i32
    return %arg1, %c0_i32 : i32, i32
  }
  func.func @transform_4(%arg0: i32, %arg1: i32) -> (i32, i32) {
    %c0_i32 = arith.constant 0 : i32
    %c0_i32_0 = arith.constant 0 : i32
    return %arg0, %c0_i32 : i32, i32
  }
}

module attributes {stable_mosaic.version = 11 : i64} {
  func.func @_norm_matmul_kernel(%arg0: i32, %arg1: i32, %arg2: memref<64x32xf32, #tpu.memory_space<vmem>>, %arg3: memref<32x96xbf16, #tpu.memory_space<vmem>>, %arg4: memref<64x96xf32, #tpu.memory_space<vmem>>) attributes {dimension_semantics = [#tpu.dimension_semantics<parallel>, #tpu.dimension_semantics<parallel>], iteration_bounds = array<i64: 1, 1>, scalar_prefetch = 0 : i64, scratch_operands = 0 : i64, tpu.core_type = #tpu.core_type<tc>, window_params = [{transform_indices = @transform_0, window_bounds = array<i64: 64, 32>}, {transform_indices = @transform_1, window_bounds = array<i64: 32, 96>}, {transform_indices = @transform_2, window_bounds = array<i64: 64, 96>}]} {
    %c0 = arith.constant 0 : index
    %c0_0 = arith.constant 0 : index
    %0 = vector.load %arg2[%c0, %c0_0] : memref<64x32xf32, #tpu.memory_space<vmem>>, vector<64x32xf32>
    %1 = arith.mulf %0, %0 : vector<64x32xf32>
    %cst = arith.constant dense<0.000000e+00> : vector<64xf32>
    %2 = vector.multi_reduction <add>, %1, %cst [1] : vector<64x32xf32> to vector<64xf32>
    %3 = vector.shape_cast %2 : vector<64xf32> to vector<64x1xf32>
    %cst_1 = arith.constant 3.200000e+01 : f32
    %4 = vector.broadcast %cst_1 : f32 to vector<64x1xf32>
    %5 = arith.divf %3, %4 : vector<64x1xf32>
    %cst_2 = arith.constant 9.99999974E-6 : f32
    %6 = vector.broadcast %cst_2 : f32 to vector<64x1xf32>
    %7 = arith.addf %5, %6 : vector<64x1xf32>
    %8 = math.rsqrt %7 : vector<64x1xf32>
    %9 = vector.broadcast %8 : vector<64x1xf32> to vector<64x32xf32>
    %10 = arith.mulf %0, %9 : vector<64x32xf32>
    %11 = arith.truncf %10 : vector<64x32xf32> to vector<64x32xbf16>
    %c0_3 = arith.constant 0 : index
    %c0_4 = arith.constant 0 : index
    %12 = vector.load %arg3[%c0_3, %c0_4] : memref<32x96xbf16, #tpu.memory_space<vmem>>, vector<32x96xbf16>
    %cst_5 = arith.constant dense<0.000000e+00> : vector<64x96xf32>
    %13 = tpu.matmul %11, %12, %cst_5 {dimension_numbers = #tpu.dot_dimension_numbers<[1], [0], [0], [1], [0, 0, 1, 1], [], []>} : vector<64x32xbf16>, vector<32x96xbf16>, vector<64x96xf32> -> vector<64x96xf32>
    %c0_6 = arith.constant 0 : index
    %c0_7 = arith.constant 0 : index
    %14 = vector.load %arg4[%c0_6, %c0_7] : memref<64x96xf32, #tpu.memory_space<vmem>>, vector<64x96xf32>
    tpu.vector_store %arg4[%c0_6, %c0_7], %13 {strides = array<i32>} : memref<64x96xf32, #tpu.memory_space<vmem>>, vector<64x96xf32>,
    return
  }
  func.func @transform_0(%arg0: i32, %arg1: i32) -> (i32, i32) {
    %c0_i32 = arith.constant 0 : i32
    %c0_i32_0 = arith.constant 0 : i32
    return %arg0, %c0_i32 : i32, i32
  }
  func.func @transform_1(%arg0: i32, %arg1: i32) -> (i32, i32) {
    %c0_i32 = arith.constant 0 : i32
    %c0_i32_0 = arith.constant 0 : i32
    return %c0_i32, %arg1 : i32, i32
  }
  func.func @transform_2(%arg0: i32, %arg1: i32) -> (i32, i32) {
    %c0_i32 = arith.constant 0 : i32
    return %arg0, %arg1 : i32, i32
  }
}

module attributes {stable_mosaic.version = 11 : i64} {
  func.func @_flash_attn_kernel(%arg0: i32, %arg1: i32, %arg2: i32, %arg3: memref<1x2x8xf32, #tpu.memory_space<vmem>>, %arg4: memref<1x2x8xf32, #tpu.memory_space<vmem>>, %arg5: memref<1x2x8xf32, #tpu.memory_space<vmem>>, %arg6: memref<1x2x8xf32, #tpu.memory_space<vmem>>, %arg7: memref<2x1xf32, #tpu.memory_space<vmem>>, %arg8: memref<2x1xf32, #tpu.memory_space<vmem>>, %arg9: memref<2x8xf32, #tpu.memory_space<vmem>>) attributes {dimension_semantics = [#tpu.dimension_semantics<parallel>, #tpu.dimension_semantics<parallel>, #tpu.dimension_semantics<arbitrary>], iteration_bounds = array<i64: 128, 1, 1>, scalar_prefetch = 0 : i64, scratch_operands = 3 : i64, tpu.core_type = #tpu.core_type<tc>, window_params = [{transform_indices = @transform_0, window_bounds = array<i64: 1, 2, 8>}, {transform_indices = @transform_1, window_bounds = array<i64: 1, 2, 8>}, {transform_indices = @transform_2, window_bounds = array<i64: 1, 2, 8>}, {transform_indices = @transform_3, window_bounds = array<i64: 1, 2, 8>}]} {
    %c0_i32 = arith.constant 0 : i32
    %0 = arith.cmpi eq, %arg2, %c0_i32 : i32
    %1 = arith.extui %0 : i1 to i32
    %c0_i32_0 = arith.constant 0 : i32
    %2 = arith.cmpi ne, %1, %c0_i32_0 : i32
    scf.if %2 {
      %cst = arith.constant -1.000000e+30 : f32
      %12 = vector.broadcast %cst : f32 to vector<2x1xf32>
      %c0 = arith.constant 0 : index
      %c0_5 = arith.constant 0 : index
      %13 = vector.load %arg7[%c0, %c0_5] : memref<2x1xf32, #tpu.memory_space<vmem>>, vector<2x1xf32>
      tpu.vector_store %arg7[%c0, %c0_5], %12 {strides = array<i32>} : memref<2x1xf32, #tpu.memory_space<vmem>>, vector<2x1xf32>,
      %cst_6 = arith.constant 0.000000e+00 : f32
      %14 = vector.broadcast %cst_6 : f32 to vector<2x1xf32>
      %c0_7 = arith.constant 0 : index
      %c0_8 = arith.constant 0 : index
      %15 = vector.load %arg8[%c0_7, %c0_8] : memref<2x1xf32, #tpu.memory_space<vmem>>, vector<2x1xf32>
      tpu.vector_store %arg8[%c0_7, %c0_8], %14 {strides = array<i32>} : memref<2x1xf32, #tpu.memory_space<vmem>>, vector<2x1xf32>,
      %cst_9 = arith.constant 0.000000e+00 : f32
      %16 = vector.broadcast %cst_9 : f32 to vector<2x8xf32>
      %c0_10 = arith.constant 0 : index
      %c0_11 = arith.constant 0 : index
      %17 = vector.load %arg9[%c0_10, %c0_11] : memref<2x8xf32, #tpu.memory_space<vmem>>, vector<2x8xf32>
      tpu.vector_store %arg9[%c0_10, %c0_11], %16 {strides = array<i32>} : memref<2x8xf32, #tpu.memory_space<vmem>>, vector<2x8xf32>,
    } else {
    }
    %c2_i32 = arith.constant 2 : i32
    %3 = arith.muli %arg2, %c2_i32 : i32
    %c2_i32_1 = arith.constant 2 : i32
    %4 = arith.muli %arg1, %c2_i32_1 : i32
    %c1_i32 = arith.constant 1 : i32
    %5 = arith.addi %4, %c1_i32 : i32
    %6 = arith.cmpi sle, %3, %5 : i32
    %7 = arith.extui %6 : i1 to i32
    %c0_i32_2 = arith.constant 0 : i32
    %8 = arith.cmpi ne, %7, %c0_i32_2 : i32
    scf.if %8 {
      %c0 = arith.constant 0 : index
      %c0_5 = arith.constant 0 : index
      %c0_6 = arith.constant 0 : index
      %12 = vector.load %arg3[%c0, %c0_5, %c0_6] : memref<1x2x8xf32, #tpu.memory_space<vmem>>, vector<1x2x8xf32>
      %13 = vector.shape_cast %12 : vector<1x2x8xf32> to vector<2x8xf32>
      %14 = arith.truncf %13 : vector<2x8xf32> to vector<2x8xbf16>
      %c0_7 = arith.constant 0 : index
      %c0_8 = arith.constant 0 : index
      %c0_9 = arith.constant 0 : index
      %15 = vector.load %arg4[%c0_7, %c0_8, %c0_9] : memref<1x2x8xf32, #tpu.memory_space<vmem>>, vector<1x2x8xf32>
      %16 = vector.shape_cast %15 : vector<1x2x8xf32> to vector<2x8xf32>
      %17 = arith.truncf %16 : vector<2x8xf32> to vector<2x8xbf16>
      %cst = arith.constant dense<0.000000e+00> : vector<2x2xf32>
      %18 = tpu.matmul %14, %17, %cst {dimension_numbers = #tpu.dot_dimension_numbers<[1], [1], [0], [0], [0, 0, 1, 0], [], []>} : vector<2x8xbf16>, vector<2x8xbf16>, vector<2x2xf32> -> vector<2x2xf32>
      %cst_10 = arith.constant 0.353553385 : f32
      %19 = vector.broadcast %cst_10 : f32 to vector<2x2xf32>
      %20 = arith.mulf %18, %19 : vector<2x2xf32>
      %c2_i32_11 = arith.constant 2 : i32
      %21 = arith.muli %arg1, %c2_i32_11 : i32
      %22 = tpu.iota {dimensions = array<i32: 0>} : vector<2x2xi32>
      %23 = vector.broadcast %21 : i32 to vector<2x2xi32>
      %24 = arith.addi %23, %22 : vector<2x2xi32>
      %c2_i32_12 = arith.constant 2 : i32
      %25 = arith.muli %arg2, %c2_i32_12 : i32
      %26 = tpu.iota {dimensions = array<i32: 1>} : vector<2x2xi32>
      %27 = vector.broadcast %25 : i32 to vector<2x2xi32>
      %28 = arith.addi %27, %26 : vector<2x2xi32>
      %29 = arith.cmpi sle, %28, %24 : vector<2x2xi32>
      %cst_13 = arith.constant -1.000000e+30 : f32
      %30 = vector.broadcast %cst_13 : f32 to vector<2x2xf32>
      %31 = arith.select %29, %20, %30 : vector<2x2xi1>, vector<2x2xf32>
      %c0_14 = arith.constant 0 : index
      %c0_15 = arith.constant 0 : index
      %32 = vector.load %arg7[%c0_14, %c0_15] : memref<2x1xf32, #tpu.memory_space<vmem>>, vector<2x1xf32>
      %cst_16 = arith.constant dense<0xFF800000> : vector<2xf32>
      %33 = vector.multi_reduction <maximumf>, %31, %cst_16 [1] : vector<2x2xf32> to vector<2xf32>
      %34 = vector.shape_cast %33 : vector<2xf32> to vector<2x1xf32>
      %35 = arith.maximumf %32, %34 : vector<2x1xf32>
      %36 = arith.subf %32, %35 : vector<2x1xf32>
      %37 = math.exp %36 : vector<2x1xf32>
      %38 = vector.broadcast %35 : vector<2x1xf32> to vector<2x2xf32>
      %39 = arith.subf %31, %38 : vector<2x2xf32>
      %40 = math.exp %39 : vector<2x2xf32>
      %c0_17 = arith.constant 0 : index
      %c0_18 = arith.constant 0 : index
      %41 = vector.load %arg8[%c0_17, %c0_18] : memref<2x1xf32, #tpu.memory_space<vmem>>, vector<2x1xf32>
      %42 = arith.mulf %37, %41 : vector<2x1xf32>
      %cst_19 = arith.constant dense<0.000000e+00> : vector<2xf32>
      %43 = vector.multi_reduction <add>, %40, %cst_19 [1] : vector<2x2xf32> to vector<2xf32>
      %44 = vector.shape_cast %43 : vector<2xf32> to vector<2x1xf32>
      %45 = arith.addf %42, %44 : vector<2x1xf32>
      %c0_20 = arith.constant 0 : index
      %c0_21 = arith.constant 0 : index
      %46 = vector.load %arg8[%c0_20, %c0_21] : memref<2x1xf32, #tpu.memory_space<vmem>>, vector<2x1xf32>
      tpu.vector_store %arg8[%c0_20, %c0_21], %45 {strides = array<i32>} : memref<2x1xf32, #tpu.memory_space<vmem>>, vector<2x1xf32>,
      %c0_22 = arith.constant 0 : index
      %c0_23 = arith.constant 0 : index
      %47 = vector.load %arg9[%c0_22, %c0_23] : memref<2x8xf32, #tpu.memory_space<vmem>>, vector<2x8xf32>
      %48 = vector.broadcast %37 : vector<2x1xf32> to vector<2x8xf32>
      %49 = arith.mulf %48, %47 : vector<2x8xf32>
      %50 = arith.truncf %40 : vector<2x2xf32> to vector<2x2xbf16>
      %c0_24 = arith.constant 0 : index
      %c0_25 = arith.constant 0 : index
      %c0_26 = arith.constant 0 : index
      %51 = vector.load %arg5[%c0_24, %c0_25, %c0_26] : memref<1x2x8xf32, #tpu.memory_space<vmem>>, vector<1x2x8xf32>
      %52 = vector.shape_cast %51 : vector<1x2x8xf32> to vector<2x8xf32>
      %53 = arith.truncf %52 : vector<2x8xf32> to vector<2x8xbf16>
      %cst_27 = arith.constant dense<0.000000e+00> : vector<2x8xf32>
      %54 = tpu.matmul %50, %53, %cst_27 {dimension_numbers = #tpu.dot_dimension_numbers<[1], [0], [0], [1], [0, 0, 1, 1], [], []>} : vector<2x2xbf16>, vector<2x8xbf16>, vector<2x8xf32> -> vector<2x8xf32>
      %55 = arith.addf %49, %54 : vector<2x8xf32>
      %c0_28 = arith.constant 0 : index
      %c0_29 = arith.constant 0 : index
      %56 = vector.load %arg9[%c0_28, %c0_29] : memref<2x8xf32, #tpu.memory_space<vmem>>, vector<2x8xf32>
      tpu.vector_store %arg9[%c0_28, %c0_29], %55 {strides = array<i32>} : memref<2x8xf32, #tpu.memory_space<vmem>>, vector<2x8xf32>,
      %c0_30 = arith.constant 0 : index
      %c0_31 = arith.constant 0 : index
      %57 = vector.load %arg7[%c0_30, %c0_31] : memref<2x1xf32, #tpu.memory_space<vmem>>, vector<2x1xf32>
      tpu.vector_store %arg7[%c0_30, %c0_31], %35 {strides = array<i32>} : memref<2x1xf32, #tpu.memory_space<vmem>>, vector<2x1xf32>,
    } else {
    }
    %c0_i32_3 = arith.constant 0 : i32
    %9 = arith.cmpi eq, %arg2, %c0_i32_3 : i32
    %10 = arith.extui %9 : i1 to i32
    %c0_i32_4 = arith.constant 0 : i32
    %11 = arith.cmpi ne, %10, %c0_i32_4 : i32
    scf.if %11 {
      %c0 = arith.constant 0 : index
      %c0_5 = arith.constant 0 : index
      %12 = vector.load %arg9[%c0, %c0_5] : memref<2x8xf32, #tpu.memory_space<vmem>>, vector<2x8xf32>
      %c0_6 = arith.constant 0 : index
      %c0_7 = arith.constant 0 : index
      %13 = vector.load %arg8[%c0_6, %c0_7] : memref<2x1xf32, #tpu.memory_space<vmem>>, vector<2x1xf32>
      %14 = tpu.reciprocal %13 {approx = true} : vector<2x1xf32> -> vector<2x1xf32>
      %15 = vector.broadcast %14 : vector<2x1xf32> to vector<2x8xf32>
      %16 = arith.mulf %12, %15 : vector<2x8xf32>
      %c0_8 = arith.constant 0 : index
      %c0_9 = arith.constant 0 : index
      %c0_10 = arith.constant 0 : index
      %17 = vector.load %arg6[%c0_8, %c0_9, %c0_10] : memref<1x2x8xf32, #tpu.memory_space<vmem>>, vector<1x2x8xf32>
      %18 = vector.shape_cast %17 : vector<1x2x8xf32> to vector<2x8xf32>
      %19 = vector.shape_cast %16 : vector<2x8xf32> to vector<1x2x8xf32>
      tpu.vector_store %arg6[%c0_8, %c0_9, %c0_10], %19 {strides = array<i32>} : memref<1x2x8xf32, #tpu.memory_space<vmem>>, vector<1x2x8xf32>,
    } else {
    }
    return
  }
  func.func @transform_0(%arg0: i32, %arg1: i32, %arg2: i32) -> (i32, i32, i32) {
    %c0_i32 = arith.constant 0 : i32
    %c0_i32_0 = arith.constant 0 : i32
    return %arg0, %arg1, %c0_i32 : i32, i32, i32
  }
  func.func @transform_1(%arg0: i32, %arg1: i32, %arg2: i32) -> (i32, i32, i32) {
    %c0_i32 = arith.constant 0 : i32
    %c0_i32_0 = arith.constant 0 : i32
    return %arg0, %arg2, %c0_i32 : i32, i32, i32
  }
  func.func @transform_2(%arg0: i32, %arg1: i32, %arg2: i32) -> (i32, i32, i32) {
    %c0_i32 = arith.constant 0 : i32
    %c0_i32_0 = arith.constant 0 : i32
    return %arg0, %arg2, %c0_i32 : i32, i32, i32
  }
  func.func @transform_3(%arg0: i32, %arg1: i32, %arg2: i32) -> (i32, i32, i32) {
    %c0_i32 = arith.constant 0 : i32
    %c0_i32_0 = arith.constant 0 : i32
    return %arg0, %arg1, %c0_i32 : i32, i32, i32
  }
}

module attributes {stable_mosaic.version = 11 : i64} {
  func.func @_matmul_resid_kernel(%arg0: i32, %arg1: i32, %arg2: i32, %arg3: memref<64x32xf32, #tpu.memory_space<vmem>>, %arg4: memref<32x32xbf16, #tpu.memory_space<vmem>>, %arg5: memref<64x32xf32, #tpu.memory_space<vmem>>, %arg6: memref<64x32xf32, #tpu.memory_space<vmem>>, %arg7: memref<64x32xf32, #tpu.memory_space<vmem>>) attributes {dimension_semantics = [#tpu.dimension_semantics<parallel>, #tpu.dimension_semantics<parallel>, #tpu.dimension_semantics<arbitrary>], iteration_bounds = array<i64: 1, 1, 1>, scalar_prefetch = 0 : i64, scratch_operands = 1 : i64, tpu.core_type = #tpu.core_type<tc>, window_params = [{transform_indices = @transform_0, window_bounds = array<i64: 64, 32>}, {transform_indices = @transform_1, window_bounds = array<i64: 32, 32>}, {transform_indices = @transform_2, window_bounds = array<i64: 64, 32>}, {transform_indices = @transform_3, window_bounds = array<i64: 64, 32>}]} {
    %c0_i32 = arith.constant 0 : i32
    %0 = arith.cmpi eq, %arg2, %c0_i32 : i32
    %1 = arith.extui %0 : i1 to i32
    %c0_i32_0 = arith.constant 0 : i32
    %2 = arith.cmpi ne, %1, %c0_i32_0 : i32
    scf.if %2 {
      %cst_10 = arith.constant 0.000000e+00 : f32
      %13 = vector.broadcast %cst_10 : f32 to vector<64x32xf32>
      %c0_11 = arith.constant 0 : index
      %c0_12 = arith.constant 0 : index
      %14 = vector.load %arg7[%c0_11, %c0_12] : memref<64x32xf32, #tpu.memory_space<vmem>>, vector<64x32xf32>
      tpu.vector_store %arg7[%c0_11, %c0_12], %13 {strides = array<i32>} : memref<64x32xf32, #tpu.memory_space<vmem>>, vector<64x32xf32>,
    } else {
    }
    %c0 = arith.constant 0 : index
    %c0_1 = arith.constant 0 : index
    %3 = vector.load %arg7[%c0, %c0_1] : memref<64x32xf32, #tpu.memory_space<vmem>>, vector<64x32xf32>
    %c0_2 = arith.constant 0 : index
    %c0_3 = arith.constant 0 : index
    %4 = vector.load %arg3[%c0_2, %c0_3] : memref<64x32xf32, #tpu.memory_space<vmem>>, vector<64x32xf32>
    %5 = arith.truncf %4 : vector<64x32xf32> to vector<64x32xbf16>
    %c0_4 = arith.constant 0 : index
    %c0_5 = arith.constant 0 : index
    %6 = vector.load %arg4[%c0_4, %c0_5] : memref<32x32xbf16, #tpu.memory_space<vmem>>, vector<32x32xbf16>
    %cst = arith.constant dense<0.000000e+00> : vector<64x32xf32>
    %7 = tpu.matmul %5, %6, %cst {dimension_numbers = #tpu.dot_dimension_numbers<[1], [0], [0], [1], [0, 0, 1, 1], [], []>} : vector<64x32xbf16>, vector<32x32xbf16>, vector<64x32xf32> -> vector<64x32xf32>
    %8 = arith.addf %3, %7 : vector<64x32xf32>
    %c0_6 = arith.constant 0 : index
    %c0_7 = arith.constant 0 : index
    %9 = vector.load %arg7[%c0_6, %c0_7] : memref<64x32xf32, #tpu.memory_space<vmem>>, vector<64x32xf32>
    tpu.vector_store %arg7[%c0_6, %c0_7], %8 {strides = array<i32>} : memref<64x32xf32, #tpu.memory_space<vmem>>, vector<64x32xf32>,
    %c0_i32_8 = arith.constant 0 : i32
    %10 = arith.cmpi eq, %arg2, %c0_i32_8 : i32
    %11 = arith.extui %10 : i1 to i32
    %c0_i32_9 = arith.constant 0 : i32
    %12 = arith.cmpi ne, %11, %c0_i32_9 : i32
    scf.if %12 {
      %c0_10 = arith.constant 0 : index
      %c0_11 = arith.constant 0 : index
      %13 = vector.load %arg5[%c0_10, %c0_11] : memref<64x32xf32, #tpu.memory_space<vmem>>, vector<64x32xf32>
      %c0_12 = arith.constant 0 : index
      %c0_13 = arith.constant 0 : index
      %14 = vector.load %arg7[%c0_12, %c0_13] : memref<64x32xf32, #tpu.memory_space<vmem>>, vector<64x32xf32>
      %15 = arith.addf %13, %14 : vector<64x32xf32>
      %c0_14 = arith.constant 0 : index
      %c0_15 = arith.constant 0 : index
      %16 = vector.load %arg6[%c0_14, %c0_15] : memref<64x32xf32, #tpu.memory_space<vmem>>, vector<64x32xf32>
      tpu.vector_store %arg6[%c0_14, %c0_15], %15 {strides = array<i32>} : memref<64x32xf32, #tpu.memory_space<vmem>>, vector<64x32xf32>,
    } else {
    }
    return
  }
  func.func @transform_0(%arg0: i32, %arg1: i32, %arg2: i32) -> (i32, i32) {
    %c0_i32 = arith.constant 0 : i32
    return %arg0, %arg2 : i32, i32
  }
  func.func @transform_1(%arg0: i32, %arg1: i32, %arg2: i32) -> (i32, i32) {
    %c0_i32 = arith.constant 0 : i32
    return %arg2, %arg1 : i32, i32
  }
  func.func @transform_2(%arg0: i32, %arg1: i32, %arg2: i32) -> (i32, i32) {
    %c0_i32 = arith.constant 0 : i32
    return %arg0, %arg1 : i32, i32
  }
  func.func @transform_3(%arg0: i32, %arg1: i32, %arg2: i32) -> (i32, i32) {
    %c0_i32 = arith.constant 0 : i32
    return %arg0, %arg1 : i32, i32
  }
}

module attributes {stable_mosaic.version = 11 : i64} {
  func.func @_swiglu_ffn_kernel(%arg0: i32, %arg1: i32, %arg2: memref<64x32xf32, #tpu.memory_space<vmem>>, %arg3: memref<32x96xbf16, #tpu.memory_space<vmem>>, %arg4: memref<32x96xbf16, #tpu.memory_space<vmem>>, %arg5: memref<96x32xbf16, #tpu.memory_space<vmem>>, %arg6: memref<64x32xf32, #tpu.memory_space<vmem>>, %arg7: memref<64x32xf32, #tpu.memory_space<vmem>>) attributes {dimension_semantics = [#tpu.dimension_semantics<parallel>, #tpu.dimension_semantics<arbitrary>], iteration_bounds = array<i64: 1, 1>, scalar_prefetch = 0 : i64, scratch_operands = 1 : i64, tpu.core_type = #tpu.core_type<tc>, window_params = [{transform_indices = @transform_0, window_bounds = array<i64: 64, 32>}, {transform_indices = @transform_1, window_bounds = array<i64: 32, 96>}, {transform_indices = @transform_2, window_bounds = array<i64: 32, 96>}, {transform_indices = @transform_3, window_bounds = array<i64: 96, 32>}, {transform_indices = @transform_4, window_bounds = array<i64: 64, 32>}]} {
    %c0_i32 = arith.constant 0 : i32
    %0 = arith.cmpi eq, %arg1, %c0_i32 : i32
    %1 = arith.extui %0 : i1 to i32
    %c0_i32_0 = arith.constant 0 : i32
    %2 = arith.cmpi ne, %1, %c0_i32_0 : i32
    scf.if %2 {
      %cst_21 = arith.constant 0.000000e+00 : f32
      %36 = vector.broadcast %cst_21 : f32 to vector<64x32xf32>
      %c0_22 = arith.constant 0 : index
      %c0_23 = arith.constant 0 : index
      %37 = vector.load %arg7[%c0_22, %c0_23] : memref<64x32xf32, #tpu.memory_space<vmem>>, vector<64x32xf32>
      tpu.vector_store %arg7[%c0_22, %c0_23], %36 {strides = array<i32>} : memref<64x32xf32, #tpu.memory_space<vmem>>, vector<64x32xf32>,
    } else {
    }
    %c0 = arith.constant 0 : index
    %c0_1 = arith.constant 0 : index
    %3 = vector.load %arg2[%c0, %c0_1] : memref<64x32xf32, #tpu.memory_space<vmem>>, vector<64x32xf32>
    %4 = arith.mulf %3, %3 : vector<64x32xf32>
    %cst = arith.constant dense<0.000000e+00> : vector<64xf32>
    %5 = vector.multi_reduction <add>, %4, %cst [1] : vector<64x32xf32> to vector<64xf32>
    %6 = vector.shape_cast %5 : vector<64xf32> to vector<64x1xf32>
    %cst_2 = arith.constant 3.200000e+01 : f32
    %7 = vector.broadcast %cst_2 : f32 to vector<64x1xf32>
    %8 = arith.divf %6, %7 : vector<64x1xf32>
    %cst_3 = arith.constant 9.99999974E-6 : f32
    %9 = vector.broadcast %cst_3 : f32 to vector<64x1xf32>
    %10 = arith.addf %8, %9 : vector<64x1xf32>
    %11 = math.rsqrt %10 : vector<64x1xf32>
    %12 = vector.broadcast %11 : vector<64x1xf32> to vector<64x32xf32>
    %13 = arith.mulf %3, %12 : vector<64x32xf32>
    %14 = arith.truncf %13 : vector<64x32xf32> to vector<64x32xbf16>
    %c0_4 = arith.constant 0 : index
    %c0_5 = arith.constant 0 : index
    %15 = vector.load %arg3[%c0_4, %c0_5] : memref<32x96xbf16, #tpu.memory_space<vmem>>, vector<32x96xbf16>
    %cst_6 = arith.constant dense<0.000000e+00> : vector<64x96xf32>
    %16 = tpu.matmul %14, %15, %cst_6 {dimension_numbers = #tpu.dot_dimension_numbers<[1], [0], [0], [1], [0, 0, 1, 1], [], []>} : vector<64x32xbf16>, vector<32x96xbf16>, vector<64x96xf32> -> vector<64x96xf32>
    %c0_7 = arith.constant 0 : index
    %c0_8 = arith.constant 0 : index
    %17 = vector.load %arg4[%c0_7, %c0_8] : memref<32x96xbf16, #tpu.memory_space<vmem>>, vector<32x96xbf16>
    %cst_9 = arith.constant dense<0.000000e+00> : vector<64x96xf32>
    %18 = tpu.matmul %14, %17, %cst_9 {dimension_numbers = #tpu.dot_dimension_numbers<[1], [0], [0], [1], [0, 0, 1, 1], [], []>} : vector<64x32xbf16>, vector<32x96xbf16>, vector<64x96xf32> -> vector<64x96xf32>
    %cst_10 = arith.constant 0.000000e+00 : f32
    %19 = vector.broadcast %cst_10 : f32 to vector<64x96xf32>
    %20 = arith.subf %19, %16 : vector<64x96xf32>
    %21 = math.exp %20 : vector<64x96xf32>
    %cst_11 = arith.constant 1.000000e+00 : f32
    %22 = vector.broadcast %cst_11 : f32 to vector<64x96xf32>
    %23 = arith.addf %22, %21 : vector<64x96xf32>
    %24 = tpu.reciprocal %23 {approx = true} : vector<64x96xf32> -> vector<64x96xf32>
    %25 = arith.mulf %16, %24 : vector<64x96xf32>
    %26 = arith.mulf %25, %18 : vector<64x96xf32>
    %c0_12 = arith.constant 0 : index
    %c0_13 = arith.constant 0 : index
    %27 = vector.load %arg7[%c0_12, %c0_13] : memref<64x32xf32, #tpu.memory_space<vmem>>, vector<64x32xf32>
    %28 = arith.truncf %26 : vector<64x96xf32> to vector<64x96xbf16>
    %c0_14 = arith.constant 0 : index
    %c0_15 = arith.constant 0 : index
    %29 = vector.load %arg5[%c0_14, %c0_15] : memref<96x32xbf16, #tpu.memory_space<vmem>>, vector<96x32xbf16>
    %cst_16 = arith.constant dense<0.000000e+00> : vector<64x32xf32>
    %30 = tpu.matmul %28, %29, %cst_16 {dimension_numbers = #tpu.dot_dimension_numbers<[1], [0], [0], [1], [0, 0, 1, 1], [], []>} : vector<64x96xbf16>, vector<96x32xbf16>, vector<64x32xf32> -> vector<64x32xf32>
    %31 = arith.addf %27, %30 : vector<64x32xf32>
    %c0_17 = arith.constant 0 : index
    %c0_18 = arith.constant 0 : index
    %32 = vector.load %arg7[%c0_17, %c0_18] : memref<64x32xf32, #tpu.memory_space<vmem>>, vector<64x32xf32>
    tpu.vector_store %arg7[%c0_17, %c0_18], %31 {strides = array<i32>} : memref<64x32xf32, #tpu.memory_space<vmem>>, vector<64x32xf32>,
    %c0_i32_19 = arith.constant 0 : i32
    %33 = arith.cmpi eq, %arg1, %c0_i32_19 : i32
    %34 = arith.extui %33 : i1 to i32
    %c0_i32_20 = arith.constant 0 : i32
    %35 = arith.cmpi ne, %34, %c0_i32_20 : i32
    scf.if %35 {
      %c0_21 = arith.constant 0 : index
      %c0_22 = arith.constant 0 : index
      %36 = vector.load %arg7[%c0_21, %c0_22] : memref<64x32xf32, #tpu.memory_space<vmem>>, vector<64x32xf32>
      %37 = arith.addf %3, %36 : vector<64x32xf32>
      %c0_23 = arith.constant 0 : index
      %c0_24 = arith.constant 0 : index
      %38 = vector.load %arg6[%c0_23, %c0_24] : memref<64x32xf32, #tpu.memory_space<vmem>>, vector<64x32xf32>
      tpu.vector_store %arg6[%c0_23, %c0_24], %37 {strides = array<i32>} : memref<64x32xf32, #tpu.memory_space<vmem>>, vector<64x32xf32>,
    } else {
    }
    return
  }
  func.func @transform_0(%arg0: i32, %arg1: i32) -> (i32, i32) {
    %c0_i32 = arith.constant 0 : i32
    %c0_i32_0 = arith.constant 0 : i32
    return %arg0, %c0_i32 : i32, i32
  }
  func.func @transform_1(%arg0: i32, %arg1: i32) -> (i32, i32) {
    %c0_i32 = arith.constant 0 : i32
    %c0_i32_0 = arith.constant 0 : i32
    return %c0_i32, %arg1 : i32, i32
  }
  func.func @transform_2(%arg0: i32, %arg1: i32) -> (i32, i32) {
    %c0_i32 = arith.constant 0 : i32
    %c0_i32_0 = arith.constant 0 : i32
    return %c0_i32, %arg1 : i32, i32
  }
  func.func @transform_3(%arg0: i32, %arg1: i32) -> (i32, i32) {
    %c0_i32 = arith.constant 0 : i32
    %c0_i32_0 = arith.constant 0 : i32
    return %arg1, %c0_i32 : i32, i32
  }
  func.func @transform_4(%arg0: i32, %arg1: i32) -> (i32, i32) {
    %c0_i32 = arith.constant 0 : i32
    %c0_i32_0 = arith.constant 0 : i32
    return %arg0, %c0_i32 : i32, i32
  }
}

module attributes {stable_mosaic.version = 11 : i64} {
  func.func @_norm_matmul_kernel(%arg0: i32, %arg1: i32, %arg2: memref<32x32xf32, #tpu.memory_space<vmem>>, %arg3: memref<32x32xbf16, #tpu.memory_space<vmem>>, %arg4: memref<32x32xf32, #tpu.memory_space<vmem>>) attributes {dimension_semantics = [#tpu.dimension_semantics<parallel>, #tpu.dimension_semantics<parallel>], iteration_bounds = array<i64: 1, 1>, scalar_prefetch = 0 : i64, scratch_operands = 0 : i64, tpu.core_type = #tpu.core_type<tc>, window_params = [{transform_indices = @transform_0, window_bounds = array<i64: 32, 32>}, {transform_indices = @transform_1, window_bounds = array<i64: 32, 32>}, {transform_indices = @transform_2, window_bounds = array<i64: 32, 32>}]} {
    %c0 = arith.constant 0 : index
    %c0_0 = arith.constant 0 : index
    %0 = vector.load %arg2[%c0, %c0_0] : memref<32x32xf32, #tpu.memory_space<vmem>>, vector<32x32xf32>
    %1 = arith.mulf %0, %0 : vector<32x32xf32>
    %cst = arith.constant dense<0.000000e+00> : vector<32xf32>
    %2 = vector.multi_reduction <add>, %1, %cst [1] : vector<32x32xf32> to vector<32xf32>
    %3 = vector.shape_cast %2 : vector<32xf32> to vector<32x1xf32>
    %cst_1 = arith.constant 3.200000e+01 : f32
    %4 = vector.broadcast %cst_1 : f32 to vector<32x1xf32>
    %5 = arith.divf %3, %4 : vector<32x1xf32>
    %cst_2 = arith.constant 9.99999974E-6 : f32
    %6 = vector.broadcast %cst_2 : f32 to vector<32x1xf32>
    %7 = arith.addf %5, %6 : vector<32x1xf32>
    %8 = math.rsqrt %7 : vector<32x1xf32>
    %9 = vector.broadcast %8 : vector<32x1xf32> to vector<32x32xf32>
    %10 = arith.mulf %0, %9 : vector<32x32xf32>
    %11 = arith.truncf %10 : vector<32x32xf32> to vector<32x32xbf16>
    %c0_3 = arith.constant 0 : index
    %c0_4 = arith.constant 0 : index
    %12 = vector.load %arg3[%c0_3, %c0_4] : memref<32x32xbf16, #tpu.memory_space<vmem>>, vector<32x32xbf16>
    %cst_5 = arith.constant dense<0.000000e+00> : vector<32x32xf32>
    %13 = tpu.matmul %11, %12, %cst_5 {dimension_numbers = #tpu.dot_dimension_numbers<[1], [0], [0], [1], [0, 0, 1, 1], [], []>} : vector<32x32xbf16>, vector<32x32xbf16>, vector<32x32xf32> -> vector<32x32xf32>
    %c0_6 = arith.constant 0 : index
    %c0_7 = arith.constant 0 : index
    %14 = vector.load %arg4[%c0_6, %c0_7] : memref<32x32xf32, #tpu.memory_space<vmem>>, vector<32x32xf32>
    tpu.vector_store %arg4[%c0_6, %c0_7], %13 {strides = array<i32>} : memref<32x32xf32, #tpu.memory_space<vmem>>, vector<32x32xf32>,
    return
  }
  func.func @transform_0(%arg0: i32, %arg1: i32) -> (i32, i32) {
    %c0_i32 = arith.constant 0 : i32
    %c0_i32_0 = arith.constant 0 : i32
    return %arg0, %c0_i32 : i32, i32
  }
  func.func @transform_1(%arg0: i32, %arg1: i32) -> (i32, i32) {
    %c0_i32 = arith.constant 0 : i32
    %c0_i32_0 = arith.constant 0 : i32
    return %c0_i32, %arg1 : i32, i32
  }
  func.func @transform_2(%arg0: i32, %arg1: i32) -> (i32, i32) {
    %c0_i32 = arith.constant 0 : i32
    return %arg0, %arg1 : i32, i32
  }
}

</mosaic_0001>

<bundles_post_ra>
// kernel: gpt_forward.19
= control target key start
LH: loop header
LB: loop body
LE: loop exit
PB: predicated region body
PF: predicated region fallthrough
CT: control target
= control target key end

     0   :  { %s772_s12 = smov 0   ;;  %s774_s13 = smov 0   ;;  %s838_s0 = inlined_call_operand.vmem [shape: f32[8,16,8], index: 0, kind: input, shape index: {}]   ;;  %s839_s1 = inlined_call_operand.vmem [shape: f32[8,16,8], index: 1, kind: input, shape index: {}]   ;;  %s840_s2 = inlined_call_operand.vmem [shape: f32[8,16,8], index: 2, kind: input, shape index: {}]   ;;  %s841_s3 = inlined_call_operand.vmem [shape: f32[8,16,8], index: 3, kind: output, shape index: {}]  }
   0x1   :  { %s776_s14 = smov 0  }
   0x2 LB: > { %s32_s15 = sadd.s32 1, %s742_s13  ;;  %p649_p0 = scmp.ge.s32.totalorder %s746_s14, 1  ;;  %s746_s14 = sphi %s776_s14, %s13_s14   ;;  %s742_s13 = sphi %s774_s13, %s843_s13   ;;  %s738_s12 = sphi %s772_s12, %s842_s12  }
   0x3   : > { %p34_p1 = scmp.ge.s32.totalorder %s32_s15, 8  ;;  %p199_p2 = scmp.lt.s32.totalorder %s746_s14, 9 }
   0x5   : > { %s845_s15 = smov (%p34_p1, %s32_s15), 0  ;;  %p200_p3 = pnand %p649_p0, %p199_p2 }
   0x6   : > { %p250_p4 = scmp.lt.s32.totalorder (!%p200_p3), %s738_s12, 7 }
   0x7   : > { %203 = sbr.rel (%p200_p3) target bundleno = 799 (0x31f), region = 32 }
   0xc   : > { %vm299_vm0 = vcmask 64512   ;;  %v748_v0 = vmov 0.0   ;;  %vm749_vm1 = vmmov 0   ;;  %s847_s12 = smov (!%p250_p4, %s738_s12), 7  ;;  %vm294_vm2 = vcmask 7168  }
   0xd   : > { %670 = vmatprep.subr.bf16.mxu0 %v748_v0  ;;  %300 = vst.msk [vmem:[#allocation4] sm:$0xff] %vm299_vm0, %v748_v0  ;;  %301 = vst.msk [vmem:[#allocation4 + $0x8] sm:$0xff] %vm299_vm0, %v748_v0  ;;  %672 = vmatprep.mubr.msk.bf16.mxu0 %vm749_vm1, %v748_v0  ;;  %s792_s16 = sshll.u32 %s847_s12, 4  ;;  %v750_v8 = vmov -1e+30   ;;  %v365_v9 = vlaneseq  ;;  %vm381_vm4 = vcmask 130048  }
   0xe   : > { %676 = vmatprep.subr.bf16.mxu1 %v748_v0  ;;  %678 = vmatprep.mubr.msk.bf16.mxu1 %vm749_vm1, %v748_v0  ;;  %s267_s19 = scalar_lea.vmem %s839_s1, %s792_s16  ;;  %s257_s22 = scalar_lea.vmem %s838_s0, %s792_s16  ;;  %295 = vst.msk [vmem:[#allocation2] sm:$0xff] %vm294_vm2, %v750_v8  ;;  %296 = vst.msk [vmem:[#allocation2 + $0x8] sm:$0xff] %vm294_vm2, %v750_v8  ;;  %v751_v23 = vmov 0  }
   0xf   : > { %v312_v1 = vld [vmem:[%s267_s19] sm:$0xff]  ;;  %v313_v2 = vld [vmem:[%s267_s19 + $0x8] sm:$0xff]  ;;  %297 = vst.msk [vmem:[#allocation3] sm:$0xff] %vm294_vm2, %v748_v0  ;;  %298 = vst.msk [vmem:[#allocation3 + $0x8] sm:$0xff] %vm294_vm2, %v748_v0  ;;  %v366_v10 = vshrl.u32 %v365_v9, 7  ;;  %v372_v11 = vand.u32 127, %v365_v9  ;;  %710 = vset.pattern.permute.xlu1 %v751_v23  ;;  %711 = vset.pattern.permute.xlu0 %v751_v23  ;;  %s277_s25 = scalar_lea.vmem %s840_s2, %s792_s16  ;;  %s287_s28 = scalar_lea.vmem %s841_s3, %s792_s16 }
  0x10   : > { %v314_v3 = vpack.c.bf16 %v313_v2, %v312_v1  ;;  %v309_v5 = vld [vmem:[%s257_s22] sm:$0xff]  ;;  %v310_v6 = vld [vmem:[%s257_s22 + $0x8] sm:$0xff] }
  0x11   : > { %v311_v7 = vpack.c.bf16 %v310_v6, %v309_v5  ;;  %vm375_vm3 = vcmp.le.s32.totalorder %v372_v11, %v366_v10  ;;  %v367_v13 = vadd.s32 8, %v366_v10  ;;  %v442_v32 = vld [vmem:[%s277_s25] sm:$0xff]  ;;  %v443_v33 = vld [vmem:[%s277_s25 + $0x8] sm:$0xff] }
  0x12   : > { %v320_v4 = vsel %vm299_vm0, %v314_v3, 0  ;;  %v444_v34 = vpack.c.bf16 %v443_v33, %v442_v32 }
  0x13   : > { %671 = vmatpush3.bf16.xpose.msra.mxu0 %v320_v4  ;;  %vm376_vm5 = vcmp.le.s32.totalorder %v372_v11, %v367_v13 }
  0x14   : > { %677 = vmatpush3.bf16.msra.mxu1 %v444_v34  ;;  %v427_v62 = vld [vmem:[#allocation4] sm:$0xff]  ;;  %v428_v1 = vld [vmem:[#allocation4 + $0x8] sm:$0xff] }
  0x15   : > { %v379_v24 = vld [vmem:[#allocation2] sm:$0xff]  ;;  %v380_v27 = vld [vmem:[#allocation2 + $0x8] sm:$0xff] }
  0x16   : > { %v412_v50 = vld [vmem:[#allocation3] sm:$0xff]  ;;  %v413_v53 = vld [vmem:[#allocation3 + $0x8] sm:$0xff] }
  0x1a   : > { %673 = vmatmul.mubr.msk.bf16.vlgmr.msra.gmra.mxu0 %vm299_vm0, %v311_v7 }
  0xda   : > { %v356_v12 = vpop.f32.mrf.mxu0 }
  0xdb   : > { %v363_v14 = vmul.f32 0.35355338, %v356_v12 }
  0xdc   : > { %v674_v15 = vpop.f32.mrf.mxu0 }
  0xdd   : > { %v377_v16 = vsel %vm375_vm3, %v363_v14, -1e+30 }
  0xde   : > { %v359_v17 = vpop.f32.mrf.mxu0  ;;  %v382_v18 = vsel %vm381_vm4, %v377_v16, -inf }
  0xdf   : > { %v364_v19 = vmul.f32 0.35355338, %v359_v17  ;;  %383 = vmax.xlane.f32.xlu0 %v382_v18 }
  0xe0   : > { %v675_v20 = vpop.f32.mrf.mxu0 }
  0xe1   : > { %v378_v21 = vsel %vm376_vm5, %v364_v19, -1e+30 }
  0xe2   : > { %v385_v22 = vsel %vm381_vm4, %v378_v21, -inf }
  0xe3   : > { %386 = vmax.xlane.f32.xlu0 %v385_v22 }
 0x168   : > { %v384_v25 = vpop.xlane.xlu0 %383 }
 0x169   : > { %v388_v26 = vmax.f32 %v379_v24, %v384_v25 }
 0x16b   : > { %v390_v28 = vsub.f32 %v379_v24, %v388_v26  ;;  %493 = vst.msk [vmem:[#allocation2] sm:$0xff] %vm294_vm2, %v388_v26  ;;  %398 = vperm.xlu1 %710, %v388_v26  }
 0x16c   : > { %v387_v29 = vpop.xlane.xlu0 %386 }
 0x16d   : > { %v389_v30 = vmax.f32 %v380_v27, %v387_v29  ;;  %v392_v47 = vmul.f32 1.442695, %v390_v28 }
 0x16f   : > { %v391_v31 = vsub.f32 %v380_v27, %v389_v30  ;;  %494 = vst.msk [vmem:[#allocation2 + $0x8] sm:$0xff] %vm294_vm2, %v389_v30  ;;  %403 = vperm.xlu1 %710, %v389_v30  }
 0x171   : > { %v394_v44 = vmul.f32 1.442695, %v391_v31 }
 0x1e6   : > { %v399_v35 = vpop.permute.xlu1 %398 }
 0x1e7   : > { %v406_v36 = vsub.f32 %v377_v16, %v399_v35 }
 0x1e9   : > { %v408_v37 = vmul.f32 1.442695, %v406_v36 }
 0x1ea   : > { %v404_v38 = vpop.permute.xlu1 %403 }
 0x1eb   : > { %712 = vpow2.f32 %v408_v37  ;;  %v407_v39 = vsub.f32 %v378_v21, %v404_v38 }
 0x1ed   : > { %v410_v40 = vmul.f32 1.442695, %v407_v39 }
 0x1ef   : > { %714 = vpow2.f32 %v410_v40 }
 0x1f0   : > { %716 = vpow2.f32 %v394_v44 }
 0x1f1   : > { %718 = vpow2.f32 %v392_v47 }
 0x1f8   : > { %v713_v41 = vpop.eup %712 }
 0x1f9   : > { %v416_v42 = vsel %vm381_vm4, %v713_v41, 0.0 }
 0x1fa   : > { %417 = vadd.xlane.f32.xlu0 %v416_v42 }
 0x1fc   : > { %v715_v43 = vpop.eup %714 }
 0x1fd   : > { %v419_v45 = vsel %vm381_vm4, %v715_v43, 0.0  ;;  %v441_v46 = vpack.c.bf16 %v715_v43, %v713_v41  ;;  %v717_v48 = vpop.eup %716 }
 0x1fe   : > { %420 = vadd.xlane.f32.xlu1 %v419_v45  ;;  %v719_v49 = vpop.eup %718  ;;  %v415_v55 = vmul.f32 %v717_v48, %v413_v53 }
 0x1ff   : > { %679 = vmatmul.mubr.msk.bf16.vlgmr.msra.gmra.mxu1 %vm381_vm4, %v441_v46  ;;  %v414_v51 = vmul.f32 %v719_v49, %v412_v50 }
 0x20f   : > { %436 = vperm.xlu1 %710, %v717_v48  }
 0x210   : > { %431 = vperm.xlu0 %711, %v719_v49  }
 0x283   : > { %v418_v52 = vpop.xlane.xlu0 %417 }
 0x284   : > { %v422_v54 = vadd.f32 %v418_v52, %v414_v51 }
 0x286   : > { %425 = vst.msk [vmem:[#allocation3] sm:$0xff] %vm294_vm2, %v422_v54 }
 0x287   : > { %v421_v56 = vpop.xlane.xlu1 %420 }
 0x288   : > { %v423_v57 = vadd.f32 %v421_v56, %v415_v55 }
 0x28a   : > { %426 = vst.msk [vmem:[#allocation3 + $0x8] sm:$0xff] %vm294_vm2, %v423_v57 }
 0x28b   : > { %v432_v63 = vpop.permute.xlu0 %431  ;;  %v437_v2 = vpop.permute.xlu1 %436 }
 0x28c   : > { %v439_v0 = vmul.f32 %v432_v63, %v427_v62  ;;  %v440_v6 = vmul.f32 %v437_v2, %v428_v1 }
 0x28d   : > { %v500_v58 = vld [vmem:[#allocation3] sm:$0xff] }
 0x28e   : > { %720 = vrcp.f32 %v500_v58 }
 0x291   : > { %v501_v59 = vld [vmem:[#allocation3 + $0x8] sm:$0xff] }
 0x292   : > { %722 = vrcp.f32 %v501_v59 }
 0x29b   : > { %v721_v60 = vpop.eup %720 }
 0x29c   : > { %506 = vperm.xlu0 %711, %v721_v60  }
 0x29f   : > { %v723_v61 = vpop.eup %722 }
 0x2a0   : > { %511 = vperm.xlu0 %711, %v723_v61  }
 0x2bf   : > { %v482_v3 = vpop.f32.mrf.mxu1 }
 0x2c0   : > { %v489_v4 = vadd.f32 %v482_v3, %v439_v0 }
 0x2c1   : > { %v680_v5 = vpop.f32.mrf.mxu1 }
 0x2c2   : > { %491 = vst.msk [vmem:[#allocation4] sm:$0xff] %vm299_vm0, %v489_v4 }
 0x2c3   : > { %v485_v7 = vpop.f32.mrf.mxu1 }
 0x2c4   : > { %v490_v8 = vadd.f32 %v485_v7, %v440_v6 }
 0x2c5   : > { %v681_v9 = vpop.f32.mrf.mxu1 }
 0x2c6   : > { %492 = vst.msk [vmem:[#allocation4 + $0x8] sm:$0xff] %vm299_vm0, %v490_v8 }
 0x2c9   : > { %v498_v10 = vld [vmem:[#allocation4] sm:$0xff] }
 0x2cd   : > { %v499_v13 = vld [vmem:[#allocation4 + $0x8] sm:$0xff] }
 0x317   : > { %v507_v11 = vpop.permute.xlu0 %506 }
 0x318   : > { %v514_v12 = vmul.f32 %v507_v11, %v498_v10 }
 0x31a   : > { %517 = vst.msk [vmem:[%s287_s28] sm:$0xff] %vm299_vm0, %v514_v12 }
 0x31b   : > { %v512_v14 = vpop.permute.xlu0 %511 }
 0x31c   : > { %v515_v15 = vmul.f32 %v512_v14, %v499_v13 }
 0x31e   : > { %518 = vst.msk [vmem:[%s287_s28 + $0x8] sm:$0xff] %vm299_vm0, %v515_v15 }
 0x31f PF: > { %s13_s14 = sadd.s32 1, %s746_s14   ;;  %s842_s12 = smov %s742_s13 }
 0x320   : > { %p10_p5 = scmp.ge.s32.totalorder %s13_s14, 10   ;;  %s843_s13 = smov %s845_s15 }
 0x322   :  { %12 = sbr.rel (!%p10_p5) target bundleno = 2 (0x2), region = 80 }

// kernel: gpt_forward.18
= control target key start
LH: loop header
LB: loop body
LE: loop exit
PB: predicated region body
PF: predicated region fallthrough
CT: control target
= control target key end

     0   :  { %vm20_vm0 = vcmask 261120   ;;  %vm123_vm1 = vcmask 785408   ;;  %s209_s0 = inlined_call_operand.vmem [shape: f32[32,32], index: 0, kind: input, shape index: {}]   ;;  %s210_s1 = inlined_call_operand.vmem [shape: bf16[32,96], index: 1, kind: input, shape index: {}]   ;;  %s211_s2 = inlined_call_operand.vmem [shape: f32[32,96], index: 2, kind: output, shape index: {}]  }
   0x1   :  { %v14_v0 = vld [vmem:[%s209_s0 + $0x10] sm:$0xff]  ;;  %v12_v1 = vld [vmem:[%s209_s0] sm:$0xff]  ;;  %v15_v2 = vld [vmem:[%s209_s0 + $0x18] sm:$0xff] }
   0x2   :  { %v18_v3 = vmul.f32 %v14_v0, %v14_v0  ;;  %v16_v4 = vmul.f32 %v12_v1, %v12_v1  ;;  %v19_v5 = vmul.f32 %v15_v2, %v15_v2  ;;  %v13_v6 = vld [vmem:[%s209_s0 + $0x8] sm:$0xff]  ;;  %v149_v13 = vld [vmem:[%s210_s1] sm:$0xff]  }
   0x3   :  { %v17_v7 = vmul.f32 %v13_v6, %v13_v6  ;;  %v148_v12 = vld [vmem:[%s210_s1 + $0x8] sm:$0xff]  }
   0x4   :  { %v27_v8 = vsel %vm20_vm0, %v18_v3, 0.0  ;;  %v21_v9 = vsel %vm20_vm0, %v16_v4, 0.0  ;;  %v30_v10 = vsel %vm20_vm0, %v19_v5, 0.0  ;;  %140 = vmatprep.subr.bf16.mxu0 %v148_v12 }
   0x5   :  { %28 = vadd.xlane.f32.xlu1 %v27_v8  ;;  %22 = vadd.xlane.f32.xlu0 %v21_v9  ;;  %v24_v11 = vsel %vm20_vm0, %v17_v7, 0.0 }
   0x6   :  { %141 = vmatpush3.bf16.msra.mxu0 %v148_v12 }
   0x7   :  { %142 = vmatprep.subr.bf16.mxu0 %v149_v13 }
   0x9   :  { %31 = vadd.xlane.f32.xlu1 %v30_v10  ;;  %25 = vadd.xlane.f32.xlu0 %v24_v11 }
   0xa   :  { %143 = vmatpush3.bf16.msra.mxu0 %v149_v13 }
  0x8e   :  { %v29_v14 = vpop.xlane.xlu1 %28  ;;  %v23_v15 = vpop.xlane.xlu0 %22 }
  0x8f   :  { %v36_v16 = vmul.f32 0.03125, %v29_v14  ;;  %v34_v17 = vmul.f32 0.03125, %v23_v15 }
  0x91   :  { %v40_v18 = vadd.f32 1e-05, %v36_v16  ;;  %v38_v19 = vadd.f32 1e-05, %v34_v17 }
  0x92   :  { %v32_v20 = vpop.xlane.xlu1 %31  ;;  %v26_v21 = vpop.xlane.xlu0 %25 }
  0x93   :  { %v37_v22 = vmul.f32 0.03125, %v32_v20  ;;  %v35_v23 = vmul.f32 0.03125, %v26_v21  ;;  %150 = vrsqrt.f32 %v40_v18 }
  0x94   :  { %152 = vrsqrt.f32 %v38_v19 }
  0x95   :  { %v41_v24 = vadd.f32 1e-05, %v37_v22  ;;  %v39_v25 = vadd.f32 1e-05, %v35_v23 }
  0x97   :  { %154 = vrsqrt.f32 %v41_v24 }
  0x98   :  { %156 = vrsqrt.f32 %v39_v25 }
  0xa0   :  { %v151_v26 = vpop.eup %150 }
  0xa1   :  { %v153_v27 = vpop.eup %152  ;;  %v48_v30 = vmul.f32 %v151_v26, %v14_v0 }
  0xa2   :  { %v46_v32 = vmul.f32 %v153_v27, %v12_v1 }
  0xa4   :  { %v155_v28 = vpop.eup %154 }
  0xa5   :  { %v157_v29 = vpop.eup %156  ;;  %v49_v31 = vmul.f32 %v155_v28, %v15_v2 }
  0xa6   :  { %v47_v33 = vmul.f32 %v157_v29, %v13_v6 }
  0xa7   :  { %v51_v34 = vpack.c.bf16 %v49_v31, %v48_v30 }
  0xa8   :  { %v50_v35 = vpack.c.bf16 %v47_v33, %v46_v32 }
  0xaa   :  { %144 = vmatprep.mubr.msk.bf16.mxu0 %vm20_vm0, %v50_v35 }
  0xab   :  { %145 = vmatmul.mubr.msk.bf16.vlgmr.msra.gmra.mxu0 %vm20_vm0, %v51_v34 }
 0x16b   :  { %v146_v36 = vpop.f32.mrf.mxu0 }
 0x16c   :  { %126 = vst.msk [vmem:[%s211_s2 + $0x10] sm:$0xff] %vm123_vm1, %v146_v36 }
 0x16d   :  { %v108_v37 = vpop.f32.mrf.mxu0 }
 0x16e   :  { %124 = vst.msk [vmem:[%s211_s2] sm:$0xff] %vm123_vm1, %v108_v37 }
 0x16f   :  { %v147_v38 = vpop.f32.mrf.mxu0 }
 0x170   :  { %127 = vst.msk [vmem:[%s211_s2 + $0x18] sm:$0xff] %vm123_vm1, %v147_v38 }
 0x171   :  { %v111_v39 = vpop.f32.mrf.mxu0 }
 0x172   :  { %125 = vst.msk [vmem:[%s211_s2 + $0x8] sm:$0xff] %vm123_vm1, %v111_v39 }

// kernel: gpt_forward.20
= control target key start
LH: loop header
LB: loop body
LE: loop exit
PB: predicated region body
PF: predicated region fallthrough
CT: control target
= control target key end

     0   :  { %vm19_vm0 = vcmask 261120   ;;  %v156_v1 = vmov 0.0   ;;  %s233_s1 = inlined_call_operand.vmem [shape: bf16[32,32], index: 1, kind: input, shape index: {}]   ;;  %s234_s0 = inlined_call_operand.vmem [shape: f32[32,32], index: 0, kind: input, shape index: {}]   ;;  %s235_s2 = inlined_call_operand.vmem [shape: f32[32,32], index: 2, kind: input, shape index: {}]   ;;  %s236_s3 = inlined_call_operand.vmem [shape: f32[32,32], index: 3, kind: output, shape index: {}]  }
   0x1   :  { %v154_v0 = vld [vmem:[%s233_s1 + $0x8] sm:$0xff]   ;;  %22 = vst.msk [vmem:[#allocation2 + $0x10] sm:$0xff] %vm19_vm0, %v156_v1  ;;  %20 = vst.msk [vmem:[#allocation2] sm:$0xff] %vm19_vm0, %v156_v1  ;;  %v155_v2 = vld [vmem:[%s233_s1] sm:$0xff]  }
   0x2   :  { %21 = vst.msk [vmem:[#allocation2 + $0x8] sm:$0xff] %vm19_vm0, %v156_v1  ;;  %23 = vst.msk [vmem:[#allocation2 + $0x18] sm:$0xff] %vm19_vm0, %v156_v1  ;;  %145 = vmatprep.subr.bf16.mxu0 %v154_v0  ;;  %v28_v3 = vld [vmem:[%s234_s0] sm:$0xff]  ;;  %v29_v4 = vld [vmem:[%s234_s0 + $0x8] sm:$0xff] }
   0x3   :  { %146 = vmatpush3.bf16.msra.mxu0 %v154_v0  ;;  %v32_v5 = vpack.c.bf16 %v29_v4, %v28_v3  ;;  %v30_v6 = vld [vmem:[%s234_s0 + $0x10] sm:$0xff]  ;;  %v31_v7 = vld [vmem:[%s234_s0 + $0x18] sm:$0xff]  ;;  %v117_v23 = vld [vmem:[%s235_s2] sm:$0xff] }
   0x4   :  { %147 = vmatprep.subr.bf16.mxu0 %v155_v2  ;;  %v33_v8 = vpack.c.bf16 %v31_v7, %v30_v6  ;;  %v119_v21 = vld [vmem:[%s235_s2 + $0x10] sm:$0xff]  ;;  %v120_v26 = vld [vmem:[%s235_s2 + $0x18] sm:$0xff]  ;;  %v118_v29 = vld [vmem:[%s235_s2 + $0x8] sm:$0xff] }
   0x5   :  { %149 = vmatprep.mubr.msk.bf16.mxu0 %vm19_vm0, %v32_v5 }
   0x7   :  { %148 = vmatpush3.bf16.msra.mxu0 %v155_v2 }
   0x8   :  { %v26_v9 = vld [vmem:[#allocation2 + $0x10] sm:$0xff]  ;;  %v24_v11 = vld [vmem:[#allocation2] sm:$0xff] }
   0x9   :  { %v27_v14 = vld [vmem:[#allocation2 + $0x18] sm:$0xff]  ;;  %v25_v17 = vld [vmem:[#allocation2 + $0x8] sm:$0xff] }
   0xa   :  { %150 = vmatmul.mubr.msk.bf16.vlgmr.msra.gmra.mxu0 %vm19_vm0, %v33_v8 }
  0xca   :  { %v151_v10 = vpop.f32.mrf.mxu0 }
  0xcb   :  { %v108_v12 = vadd.f32 %v151_v10, %v26_v9 }
  0xcc   :  { %v91_v13 = vpop.f32.mrf.mxu0 }
  0xcd   :  { %112 = vst.msk [vmem:[#allocation2 + $0x10] sm:$0xff] %vm19_vm0, %v108_v12  ;;  %v106_v15 = vadd.f32 %v91_v13, %v24_v11 }
  0xce   :  { %v152_v16 = vpop.f32.mrf.mxu0 }
  0xcf   :  { %110 = vst.msk [vmem:[#allocation2] sm:$0xff] %vm19_vm0, %v106_v15  ;;  %v109_v18 = vadd.f32 %v152_v16, %v27_v14 }
  0xd0   :  { %v94_v19 = vpop.f32.mrf.mxu0 }
  0xd1   :  { %113 = vst.msk [vmem:[#allocation2 + $0x18] sm:$0xff] %vm19_vm0, %v109_v18  ;;  %v107_v20 = vadd.f32 %v94_v19, %v25_v17 }
  0xd3   :  { %111 = vst.msk [vmem:[#allocation2 + $0x8] sm:$0xff] %vm19_vm0, %v107_v20 }
  0xd4   :  { %v123_v22 = vld [vmem:[#allocation2 + $0x10] sm:$0xff] }
  0xd5   :  { %v127_v24 = vadd.f32 %v123_v22, %v119_v21 }
  0xd6   :  { %v121_v25 = vld [vmem:[#allocation2] sm:$0xff] }
  0xd7   :  { %131 = vst.msk [vmem:[%s236_s3 + $0x10] sm:$0xff] %vm19_vm0, %v127_v24  ;;  %v125_v27 = vadd.f32 %v121_v25, %v117_v23 }
  0xd8   :  { %v124_v28 = vld [vmem:[#allocation2 + $0x18] sm:$0xff] }
  0xd9   :  { %129 = vst.msk [vmem:[%s236_s3] sm:$0xff] %vm19_vm0, %v125_v27  ;;  %v128_v30 = vadd.f32 %v124_v28, %v120_v26 }
  0xda   :  { %v122_v31 = vld [vmem:[#allocation2 + $0x8] sm:$0xff] }
  0xdb   :  { %132 = vst.msk [vmem:[%s236_s3 + $0x18] sm:$0xff] %vm19_vm0, %v128_v30  ;;  %v126_v32 = vadd.f32 %v122_v31, %v118_v29 }
  0xdd   :  { %130 = vst.msk [vmem:[%s236_s3 + $0x8] sm:$0xff] %vm19_vm0, %v126_v32 }

// kernel: gpt_forward.21
= control target key start
LH: loop header
LB: loop body
LE: loop exit
PB: predicated region body
PF: predicated region fallthrough
CT: control target
= control target key end

     0   :  { %vm22_vm0 = vcmask 261120   ;;  %v467_v44 = vmov 0.0   ;;  %vm285_vm1 = vcmask 785408   ;;  %s591_s0 = inlined_call_operand.vmem [shape: f32[32,32], index: 0, kind: input, shape index: {}]   ;;  %s592_s1 = inlined_call_operand.vmem [shape: bf16[32,96], index: 1, kind: input, shape index: {}]   ;;  %s593_s2 = inlined_call_operand.vmem [shape: bf16[32,96], index: 2, kind: input, shape index: {}]   ;;  %s594_s3 = inlined_call_operand.vmem [shape: bf16[96,32], index: 3, kind: input, shape index: {}]   ;;  %s595_s4 = inlined_call_operand.vmem [shape: f32[32,32], index: 4, kind: output, shape index: {}]  }
   0x1   :  { %v496_v0 = vld [vmem:[%s591_s0 + $0x10] sm:$0xff]  ;;  %v501_v1 = vld [vmem:[%s591_s0] sm:$0xff]  ;;  %v506_v2 = vld [vmem:[%s591_s0 + $0x18] sm:$0xff]  ;;  %25 = vst.msk [vmem:[#allocation2 + $0x10] sm:$0xff] %vm22_vm0, %v467_v44 }
   0x2   :  { %v33_v3 = vmul.f32 %v496_v0, %v496_v0  ;;  %v31_v4 = vmul.f32 %v501_v1, %v501_v1  ;;  %v34_v5 = vmul.f32 %v506_v2, %v506_v2  ;;  %v517_v6 = vld [vmem:[%s591_s0 + $0x8] sm:$0xff]  ;;  %v434_v13 = vld [vmem:[%s592_s1] sm:$0xff]   ;;  %v439_v40 = vld [vmem:[%s594_s3 + $0x18] sm:$0xff]   ;;  %23 = vst.msk [vmem:[#allocation2] sm:$0xff] %vm22_vm0, %v467_v44 }
   0x3   :  { %v32_v7 = vmul.f32 %v517_v6, %v517_v6  ;;  %v433_v12 = vld [vmem:[%s592_s1 + $0x8] sm:$0xff]   ;;  %v436_v37 = vld [vmem:[%s593_s2] sm:$0xff]   ;;  %v440_v41 = vld [vmem:[%s594_s3 + $0x10] sm:$0xff]   ;;  %24 = vst.msk [vmem:[#allocation2 + $0x8] sm:$0xff] %vm22_vm0, %v467_v44 }
   0x4   :  { %v42_v8 = vsel %vm22_vm0, %v33_v3, 0.0  ;;  %v36_v9 = vsel %vm22_vm0, %v31_v4, 0.0  ;;  %v45_v10 = vsel %vm22_vm0, %v34_v5, 0.0  ;;  %400 = vmatprep.subr.bf16.mxu1 %v433_v12  ;;  %v435_v14 = vld [vmem:[%s593_s2 + $0x8] sm:$0xff]   ;;  %v438_v39 = vld [vmem:[%s594_s3 + $0x20] sm:$0xff]   ;;  %26 = vst.msk [vmem:[#allocation2 + $0x18] sm:$0xff] %vm22_vm0, %v467_v44 }
   0x5   :  { %43 = vadd.xlane.f32.xlu1 %v42_v8  ;;  %37 = vadd.xlane.f32.xlu0 %v36_v9  ;;  %v39_v11 = vsel %vm22_vm0, %v32_v7, 0.0  ;;  %v437_v38 = vld [vmem:[%s594_s3 + $0x28] sm:$0xff]   ;;  %v442_v43 = vld [vmem:[%s594_s3] sm:$0xff]  }
   0x6   :  { %401 = vmatpush3.bf16.msra.mxu1 %v433_v12  ;;  %416 = vmatprep.subr.bf16.mxu0 %v437_v38  ;;  %v441_v42 = vld [vmem:[%s594_s3 + $0x8] sm:$0xff]  }
   0x7   :  { %402 = vmatprep.subr.bf16.mxu1 %v434_v13  ;;  %417 = vmatpush3.bf16.msra.mxu0 %v437_v38 }
   0x8   :  { %418 = vmatprep.subr.bf16.mxu0 %v438_v39 }
   0x9   :  { %46 = vadd.xlane.f32.xlu1 %v45_v10  ;;  %40 = vadd.xlane.f32.xlu0 %v39_v11 }
   0xa   :  { %403 = vmatpush3.bf16.msra.mxu1 %v434_v13 }
   0xb   :  { %408 = vmatprep.subr.bf16.mxu1 %v435_v14  ;;  %419 = vmatpush3.bf16.msra.mxu0 %v438_v39 }
   0xc   :  { %420 = vmatprep.subr.bf16.mxu0 %v439_v40 }
   0xf   :  { %421 = vmatpush3.bf16.msra.mxu0 %v439_v40 }
  0x10   :  { %422 = vmatprep.subr.bf16.mxu0 %v440_v41 }
  0x13   :  { %423 = vmatpush3.bf16.msra.mxu0 %v440_v41 }
  0x14   :  { %424 = vmatprep.subr.bf16.mxu0 %v441_v42 }
  0x17   :  { %425 = vmatpush3.bf16.msra.mxu0 %v441_v42 }
  0x18   :  { %426 = vmatprep.subr.bf16.mxu0 %v442_v43 }
  0x1b   :  { %427 = vmatpush3.bf16.msra.mxu0 %v442_v43 }
  0x8e   :  { %v44_v15 = vpop.xlane.xlu1 %43  ;;  %v38_v16 = vpop.xlane.xlu0 %37 }
  0x8f   :  { %v51_v17 = vmul.f32 0.03125, %v44_v15  ;;  %v49_v18 = vmul.f32 0.03125, %v38_v16 }
  0x91   :  { %v55_v19 = vadd.f32 1e-05, %v51_v17  ;;  %v53_v20 = vadd.f32 1e-05, %v49_v18 }
  0x92   :  { %v47_v21 = vpop.xlane.xlu1 %46  ;;  %v41_v22 = vpop.xlane.xlu0 %40 }
  0x93   :  { %v52_v23 = vmul.f32 0.03125, %v47_v21  ;;  %v50_v24 = vmul.f32 0.03125, %v41_v22  ;;  %443 = vrsqrt.f32 %v55_v19 }
  0x94   :  { %445 = vrsqrt.f32 %v53_v20 }
  0x95   :  { %v56_v25 = vadd.f32 1e-05, %v52_v23  ;;  %v54_v26 = vadd.f32 1e-05, %v50_v24  ;;  %v233_v23 = vld [vmem:[#allocation2 + $0x10] sm:$0xff] }
  0x97   :  { %447 = vrsqrt.f32 %v56_v25  ;;  %v231_v25 = vld [vmem:[#allocation2] sm:$0xff] }
  0x98   :  { %449 = vrsqrt.f32 %v54_v26 }
  0xa0   :  { %v444_v27 = vpop.eup %443 }
  0xa1   :  { %v446_v28 = vpop.eup %445  ;;  %v63_v31 = vmul.f32 %v444_v27, %v496_v0 }
  0xa2   :  { %v61_v33 = vmul.f32 %v446_v28, %v501_v1  ;;  %v234_v28 = vld [vmem:[#allocation2 + $0x18] sm:$0xff] }
  0xa4   :  { %v448_v29 = vpop.eup %447 }
  0xa5   :  { %v450_v30 = vpop.eup %449  ;;  %v64_v32 = vmul.f32 %v448_v29, %v506_v2 }
  0xa6   :  { %v62_v34 = vmul.f32 %v450_v30, %v517_v6 }
  0xa7   :  { %v66_v35 = vpack.c.bf16 %v64_v32, %v63_v31  ;;  %v232_v31 = vld [vmem:[#allocation2 + $0x8] sm:$0xff] }
  0xa8   :  { %v65_v36 = vpack.c.bf16 %v62_v34, %v61_v33 }
  0xaa   :  { %404 = vmatprep.mubr.msk.bf16.mxu1 %vm22_vm0, %v65_v36 }
  0xab   :  { %405 = vmatmul.mubr.msk.bf16.vlgmr.msra.gmra.mxu1 %vm22_vm0, %v66_v35 }
  0xac   :  { %409 = vmatpush3.bf16.msra.mxu1 %v435_v14  ;;  %412 = vmatprep.mubr.msk.bf16.mxu1 %vm22_vm0, %v65_v36 }
  0xad   :  { %410 = vmatprep.subr.bf16.mxu1 %v436_v37 }
  0xb0   :  { %411 = vmatpush3.bf16.msra.mxu1 %v436_v37 }
  0xb3   :  { %413 = vmatmul.mubr.msk.bf16.vlgmr.msra.gmra.mxu1 %vm22_vm0, %v66_v35 }
 0x16b   :  { %v406_v45 = vpop.f32.mrf.mxu1 }
 0x16c   :  { %v205_v46 = vsub.f32 0.0, %v406_v45 }
 0x16d   :  { %v123_v47 = vpop.f32.mrf.mxu1 }
 0x16e   :  { %v211_v48 = vmul.f32 1.442695, %v205_v46  ;;  %v203_v49 = vsub.f32 0.0, %v123_v47 }
 0x16f   :  { %v407_v50 = vpop.f32.mrf.mxu1 }
 0x170   :  { %451 = vpow2.f32 %v211_v48  ;;  %v207_v51 = vmul.f32 1.442695, %v203_v49  ;;  %v206_v52 = vsub.f32 0.0, %v407_v50 }
 0x171   :  { %v126_v53 = vpop.f32.mrf.mxu1 }
 0x172   :  { %453 = vpow2.f32 %v207_v51  ;;  %v213_v54 = vmul.f32 1.442695, %v206_v52  ;;  %v204_v55 = vsub.f32 0.0, %v126_v53 }
 0x173   :  { %v414_v4 = vpop.f32.mrf.mxu1 }
 0x174   :  { %455 = vpow2.f32 %v213_v54  ;;  %v209_v56 = vmul.f32 1.442695, %v204_v55 }
 0x175   :  { %v188_v5 = vpop.f32.mrf.mxu1 }
 0x176   :  { %457 = vpow2.f32 %v209_v56 }
 0x177   :  { %v415_v10 = vpop.f32.mrf.mxu1 }
 0x179   :  { %v191_v17 = vpop.f32.mrf.mxu1 }
 0x17d   :  { %v452_v57 = vpop.eup %451 }
 0x17e   :  { %v217_v59 = vadd.f32 1.0, %v452_v57 }
 0x17f   :  { %v454_v58 = vpop.eup %453 }
 0x180   :  { %v215_v60 = vadd.f32 1.0, %v454_v58 }
 0x181   :  { %v456_v61 = vpop.eup %455 }
 0x182   :  { %459 = vrcp.f32 %v215_v60  ;;  %v218_v62 = vadd.f32 1.0, %v456_v61 }
 0x183   :  { %v458_v63 = vpop.eup %457  ;;  %461 = vrcp.f32 %v217_v59 }
 0x184   :  { %463 = vrcp.f32 %v218_v62  ;;  %v216_v3 = vadd.f32 1.0, %v458_v63 }
 0x186   :  { %465 = vrcp.f32 %v216_v3 }
 0x18f   :  { %v460_v7 = vpop.eup %459 }
 0x190   :  { %v462_v8 = vpop.eup %461  ;;  %v223_v11 = vmul.f32 %v460_v7, %v123_v47 }
 0x191   :  { %v464_v9 = vpop.eup %463  ;;  %v225_v14 = vmul.f32 %v462_v8, %v406_v45 }
 0x192   :  { %v226_v12 = vmul.f32 %v464_v9, %v407_v50  ;;  %v227_v18 = vmul.f32 %v223_v11, %v188_v5 }
 0x193   :  { %v466_v13 = vpop.eup %465  ;;  %v229_v20 = vmul.f32 %v414_v4, %v225_v14 }
 0x194   :  { %v224_v15 = vmul.f32 %v466_v13, %v126_v53  ;;  %v230_v16 = vmul.f32 %v415_v10, %v226_v12 }
 0x196   :  { %v228_v19 = vmul.f32 %v224_v15, %v191_v17  ;;  %v236_v22 = vpack.c.bf16 %v230_v16, %v229_v20 }
 0x198   :  { %v235_v21 = vpack.c.bf16 %v228_v19, %v227_v18 }
 0x19a   :  { %428 = vmatprep.mubr.msk.bf16.mxu0 %vm285_vm1, %v235_v21 }
 0x19b   :  { %429 = vmatmul.mubr.msk.bf16.vlgmr.msra.gmra.mxu0 %vm285_vm1, %v236_v22 }
 0x25b   :  { %v430_v24 = vpop.f32.mrf.mxu0 }
 0x25c   :  { %v343_v26 = vadd.f32 %v430_v24, %v233_v23 }
 0x25d   :  { %v326_v27 = vpop.f32.mrf.mxu0 }
 0x25e   :  { %347 = vst.msk [vmem:[#allocation2 + $0x10] sm:$0xff] %vm22_vm0, %v343_v26  ;;  %v341_v29 = vadd.f32 %v326_v27, %v231_v25 }
 0x25f   :  { %v431_v30 = vpop.f32.mrf.mxu0 }
 0x260   :  { %345 = vst.msk [vmem:[#allocation2] sm:$0xff] %vm22_vm0, %v341_v29  ;;  %v344_v32 = vadd.f32 %v431_v30, %v234_v28 }
 0x261   :  { %v329_v33 = vpop.f32.mrf.mxu0 }
 0x262   :  { %348 = vst.msk [vmem:[#allocation2 + $0x18] sm:$0xff] %vm22_vm0, %v344_v32  ;;  %v342_v34 = vadd.f32 %v329_v33, %v232_v31 }
 0x264   :  { %346 = vst.msk [vmem:[#allocation2 + $0x8] sm:$0xff] %vm22_vm0, %v342_v34 }
 0x265   :  { %v354_v35 = vld [vmem:[#allocation2 + $0x10] sm:$0xff] }
 0x266   :  { %v358_v36 = vadd.f32 %v354_v35, %v496_v0 }
 0x267   :  { %v352_v37 = vld [vmem:[#allocation2] sm:$0xff] }
 0x268   :  { %362 = vst.msk [vmem:[%s595_s4 + $0x10] sm:$0xff] %vm22_vm0, %v358_v36  ;;  %v356_v38 = vadd.f32 %v352_v37, %v501_v1 }
 0x269   :  { %v355_v39 = vld [vmem:[#allocation2 + $0x18] sm:$0xff] }
 0x26a   :  { %360 = vst.msk [vmem:[%s595_s4] sm:$0xff] %vm22_vm0, %v356_v38  ;;  %v359_v40 = vadd.f32 %v355_v39, %v506_v2 }
 0x26b   :  { %v353_v41 = vld [vmem:[#allocation2 + $0x8] sm:$0xff] }
 0x26c   :  { %363 = vst.msk [vmem:[%s595_s4 + $0x18] sm:$0xff] %vm22_vm0, %v359_v40  ;;  %v357_v0 = vadd.f32 %v353_v41, %v517_v6 }
 0x26e   :  { %361 = vst.msk [vmem:[%s595_s4 + $0x8] sm:$0xff] %vm22_vm0, %v357_v0 }

// kernel: gpt_forward.26
= control target key start
LH: loop header
LB: loop body
LE: loop exit
PB: predicated region body
PF: predicated region fallthrough
CT: control target
= control target key end

     0   :  { %vm28_vm0 = vcmask 261120   ;;  %vm183_vm1 = vcmask 785408   ;;  %s371_s0 = inlined_call_operand.vmem [shape: f32[64,32], index: 0, kind: input, shape index: {}]   ;;  %s372_s1 = inlined_call_operand.vmem [shape: bf16[32,96], index: 1, kind: input, shape index: {}]   ;;  %s373_s2 = inlined_call_operand.vmem [shape: f32[64,96], index: 2, kind: output, shape index: {}]  }
   0x1   :  { %v260_v0 = vld [vmem:[%s371_s0 + $0x20] sm:$0xff]  ;;  %v270_v2 = vld [vmem:[%s371_s0 + $0x28] sm:$0xff]  ;;  %v288_v8 = vld [vmem:[%s371_s0 + $0x18] sm:$0xff] }
   0x2   :  { %v265_v1 = vld [vmem:[%s371_s0] sm:$0xff]  ;;  %v24_v3 = vmul.f32 %v260_v0, %v260_v0  ;;  %v25_v5 = vmul.f32 %v270_v2, %v270_v2  ;;  %v281_v6 = vld [vmem:[%s371_s0 + $0x8] sm:$0xff]  ;;  %v293_v9 = vld [vmem:[%s371_s0 + $0x10] sm:$0xff]  ;;  %v23_v14 = vmul.f32 %v288_v8, %v288_v8 }
   0x3   :  { %v20_v4 = vmul.f32 %v265_v1, %v265_v1  ;;  %v21_v7 = vmul.f32 %v281_v6, %v281_v6  ;;  %v22_v15 = vmul.f32 %v293_v9, %v293_v9  ;;  %v306_v16 = vld [vmem:[%s371_s0 + $0x38] sm:$0xff]  ;;  %v311_v17 = vld [vmem:[%s371_s0 + $0x30] sm:$0xff]  ;;  %v224_v24 = vld [vmem:[%s372_s1 + $0x8] sm:$0xff]  }
   0x4   :  { %v41_v10 = vsel %vm28_vm0, %v24_v3, 0.0  ;;  %v44_v12 = vsel %vm28_vm0, %v25_v5, 0.0  ;;  %v38_v18 = vsel %vm28_vm0, %v23_v14, 0.0  ;;  %v27_v20 = vmul.f32 %v306_v16, %v306_v16  ;;  %v225_v25 = vld [vmem:[%s372_s1] sm:$0xff]   ;;  %208 = vmatprep.subr.bf16.mxu0 %v224_v24  ;;  %220 = vmatprep.subr.bf16.mxu1 %v224_v24 }
   0x5   :  { %v29_v11 = vsel %vm28_vm0, %v20_v4, 0.0  ;;  %42 = vadd.xlane.f32.xlu1 %v41_v10  ;;  %v32_v13 = vsel %vm28_vm0, %v21_v7, 0.0  ;;  %v35_v19 = vsel %vm28_vm0, %v22_v15, 0.0  ;;  %v26_v21 = vmul.f32 %v311_v17, %v311_v17  ;;  %209 = vmatpush3.bf16.msra.mxu0 %v224_v24 }
   0x6   :  { %30 = vadd.xlane.f32.xlu0 %v29_v11  ;;  %v50_v22 = vsel %vm28_vm0, %v27_v20, 0.0  ;;  %222 = vmatpush3.bf16.msra.mxu1 %v224_v24 }
   0x7   :  { %v47_v23 = vsel %vm28_vm0, %v26_v21, 0.0  ;;  %210 = vmatprep.subr.bf16.mxu0 %v225_v25  ;;  %221 = vmatprep.subr.bf16.mxu1 %v225_v25 }
   0x9   :  { %45 = vadd.xlane.f32.xlu1 %v44_v12  ;;  %211 = vmatpush3.bf16.msra.mxu0 %v225_v25 }
   0xa   :  { %33 = vadd.xlane.f32.xlu0 %v32_v13  ;;  %223 = vmatpush3.bf16.msra.mxu1 %v225_v25 }
   0xd   :  { %39 = vadd.xlane.f32.xlu1 %v38_v18 }
   0xe   :  { %36 = vadd.xlane.f32.xlu0 %v35_v19 }
  0x11   :  { %51 = vadd.xlane.f32.xlu1 %v50_v22 }
  0x12   :  { %48 = vadd.xlane.f32.xlu0 %v47_v23 }
  0x8e   :  { %v43_v26 = vpop.xlane.xlu1 %42 }
  0x8f   :  { %v31_v27 = vpop.xlane.xlu0 %30  ;;  %v58_v28 = vmul.f32 0.03125, %v43_v26 }
  0x90   :  { %v54_v29 = vmul.f32 0.03125, %v31_v27 }
  0x91   :  { %v66_v30 = vadd.f32 1e-05, %v58_v28 }
  0x92   :  { %v62_v31 = vadd.f32 1e-05, %v54_v29  ;;  %v46_v32 = vpop.xlane.xlu1 %45 }
  0x93   :  { %v34_v33 = vpop.xlane.xlu0 %33  ;;  %v59_v34 = vmul.f32 0.03125, %v46_v32  ;;  %226 = vrsqrt.f32 %v66_v30 }
  0x94   :  { %v55_v35 = vmul.f32 0.03125, %v34_v33  ;;  %228 = vrsqrt.f32 %v62_v31 }
  0x95   :  { %v67_v36 = vadd.f32 1e-05, %v59_v34 }
  0x96   :  { %v63_v37 = vadd.f32 1e-05, %v55_v35  ;;  %v40_v38 = vpop.xlane.xlu1 %39 }
  0x97   :  { %v37_v39 = vpop.xlane.xlu0 %36  ;;  %230 = vrsqrt.f32 %v67_v36  ;;  %v57_v40 = vmul.f32 0.03125, %v40_v38 }
  0x98   :  { %v56_v41 = vmul.f32 0.03125, %v37_v39  ;;  %232 = vrsqrt.f32 %v63_v37 }
  0x99   :  { %v65_v42 = vadd.f32 1e-05, %v57_v40 }
  0x9a   :  { %v64_v43 = vadd.f32 1e-05, %v56_v41  ;;  %v52_v44 = vpop.xlane.xlu1 %51 }
  0x9b   :  { %v49_v45 = vpop.xlane.xlu0 %48  ;;  %234 = vrsqrt.f32 %v65_v42  ;;  %v61_v46 = vmul.f32 0.03125, %v52_v44 }
  0x9c   :  { %v60_v47 = vmul.f32 0.03125, %v49_v45  ;;  %236 = vrsqrt.f32 %v64_v43 }
  0x9d   :  { %v69_v48 = vadd.f32 1e-05, %v61_v46 }
  0x9e   :  { %v68_v49 = vadd.f32 1e-05, %v60_v47 }
  0x9f   :  { %238 = vrsqrt.f32 %v69_v48 }
  0xa0   :  { %240 = vrsqrt.f32 %v68_v49  ;;  %v227_v50 = vpop.eup %226 }
  0xa1   :  { %v229_v51 = vpop.eup %228  ;;  %v82_v54 = vmul.f32 %v227_v50, %v260_v0 }
  0xa2   :  { %v78_v56 = vmul.f32 %v229_v51, %v265_v1 }
  0xa4   :  { %v231_v52 = vpop.eup %230 }
  0xa5   :  { %v233_v53 = vpop.eup %232  ;;  %v83_v55 = vmul.f32 %v231_v52, %v270_v2 }
  0xa6   :  { %v79_v57 = vmul.f32 %v233_v53, %v281_v6 }
  0xa7   :  { %v88_v58 = vpack.c.bf16 %v83_v55, %v82_v54 }
  0xa8   :  { %v235_v59 = vpop.eup %234  ;;  %v86_v60 = vpack.c.bf16 %v79_v57, %v78_v56 }
  0xa9   :  { %v237_v61 = vpop.eup %236  ;;  %216 = vmatprep.mubr.msk.bf16.mxu1 %vm28_vm0, %v88_v58  ;;  %v81_v62 = vmul.f32 %v235_v59, %v288_v8 }
  0xaa   :  { %212 = vmatprep.mubr.msk.bf16.mxu0 %vm28_vm0, %v86_v60  ;;  %v80_v63 = vmul.f32 %v237_v61, %v293_v9 }
  0xac   :  { %v239_v3 = vpop.eup %238  ;;  %v87_v0 = vpack.c.bf16 %v81_v62, %v80_v63 }
  0xad   :  { %v241_v4 = vpop.eup %240  ;;  %v85_v2 = vmul.f32 %v239_v3, %v306_v16 }
  0xae   :  { %213 = vmatmul.mubr.msk.bf16.vlgmr.msra.gmra.mxu0 %vm28_vm0, %v87_v0  ;;  %v84_v1 = vmul.f32 %v241_v4, %v311_v17 }
  0xb0   :  { %v89_v5 = vpack.c.bf16 %v85_v2, %v84_v1 }
  0xb2   :  { %217 = vmatmul.mubr.msk.bf16.vlgmr.msra.gmra.mxu1 %vm28_vm0, %v89_v5 }
 0x16e   :  { %v214_v6 = vpop.f32.mrf.mxu0 }
 0x16f   :  { %186 = vst.msk [vmem:[%s373_s2 + $0x10] sm:$0xff] %vm183_vm1, %v214_v6 }
 0x170   :  { %v152_v7 = vpop.f32.mrf.mxu0 }
 0x171   :  { %184 = vst.msk [vmem:[%s373_s2] sm:$0xff] %vm183_vm1, %v152_v7 }
 0x172   :  { %v215_v8 = vpop.f32.mrf.mxu0  ;;  %v218_v9 = vpop.f32.mrf.mxu1 }
 0x173   :  { %187 = vst.msk [vmem:[%s373_s2 + $0x18] sm:$0xff] %vm183_vm1, %v215_v8  ;;  %190 = vst.msk [vmem:[%s373_s2 + $0x30] sm:$0xff] %vm183_vm1, %v218_v9 }
 0x174   :  { %v155_v10 = vpop.f32.mrf.mxu0  ;;  %v168_v11 = vpop.f32.mrf.mxu1 }
 0x175   :  { %185 = vst.msk [vmem:[%s373_s2 + $0x8] sm:$0xff] %vm183_vm1, %v155_v10  ;;  %188 = vst.msk [vmem:[%s373_s2 + $0x20] sm:$0xff] %vm183_vm1, %v168_v11 }
 0x176   :  { %v219_v12 = vpop.f32.mrf.mxu1 }
 0x177   :  { %191 = vst.msk [vmem:[%s373_s2 + $0x38] sm:$0xff] %vm183_vm1, %v219_v12 }
 0x178   :  { %v171_v13 = vpop.f32.mrf.mxu1 }
 0x179   :  { %189 = vst.msk [vmem:[%s373_s2 + $0x28] sm:$0xff] %vm183_vm1, %v171_v13 }

// kernel: gpt_forward.27
= control target key start
LH: loop header
LB: loop body
LE: loop exit
PB: predicated region body
PF: predicated region fallthrough
CT: control target
= control target key end

     0   :  { %s660_s12 = smov 0   ;;  %s662_s13 = smov 0   ;;  %s714_s0 = inlined_call_operand.vmem [shape: f32[128,2,8], index: 0, kind: input, shape index: {}]   ;;  %s715_s1 = inlined_call_operand.vmem [shape: f32[128,2,8], index: 1, kind: input, shape index: {}]   ;;  %s716_s2 = inlined_call_operand.vmem [shape: f32[128,2,8], index: 2, kind: input, shape index: {}]   ;;  %s717_s3 = inlined_call_operand.vmem [shape: f32[128,2,8], index: 3, kind: output, shape index: {}]  }
   0x1   :  { %s664_s14 = smov 0  }
   0x2 LB: > { %s32_s15 = sadd.s32 1, %s630_s13  ;;  %p551_p0 = scmp.ge.s32.totalorder %s634_s14, 1  ;;  %s634_s14 = sphi %s664_s14, %s13_s14   ;;  %s630_s13 = sphi %s662_s13, %s719_s13   ;;  %s626_s12 = sphi %s660_s12, %s718_s12  }
   0x3   : > { %p34_p1 = scmp.ge.s32.totalorder %s32_s15, 128  ;;  %p190_p2 = scmp.lt.s32.totalorder %s634_s14, 129 }
   0x5   : > { %s721_s15 = smov (%p34_p1, %s32_s15), 0  ;;  %p191_p3 = pnand %p551_p0, %p190_p2 }
   0x6   : > { %p232_p4 = scmp.lt.s32.totalorder (!%p191_p3), %s626_s12, 127 }
   0x7   : > { %194 = sbr.rel (%p191_p3) target bundleno = 795 (0x31b), region = 32 }
   0xc   : > { %vm268_vm0 = vcmask 58368   ;;  %v636_v0 = vmov 0.0   ;;  %vm637_vm1 = vmmov 0   ;;  %s723_s12 = smov (!%p232_p4, %s626_s12), 127  ;;  %vm281_vm2 = vcmask 64512  }
   0xd   : > { %269 = vst.msk [vmem:[#allocation4] sm:$0x3] %vm268_vm0, %v636_v0  ;;  %564 = vmatprep.subr.bf16.mxu0 %v636_v0  ;;  %566 = vmatprep.mubr.msk.bf16.mxu0 %vm637_vm1, %v636_v0  ;;  %s679_s16 = sshll.u32 %s723_s12, 1  ;;  %vm265_vm3 = vcmask 1024   ;;  %v638_v6 = vmov -1e+30   ;;  %v329_v7 = vlaneseq }
   0xe   : > { %570 = vmatprep.subr.bf16.mxu1 %v636_v0  ;;  %572 = vmatprep.mubr.msk.bf16.mxu1 %vm637_vm1, %v636_v0  ;;  %s245_s19 = scalar_lea.vmem %s715_s1, %s679_s16  ;;  %s238_s22 = scalar_lea.vmem %s714_s0, %s679_s16  ;;  %266 = vst.msk [vmem:[#allocation2] sm:$0x3] %vm265_vm3, %v638_v6  ;;  %267 = vst.msk [vmem:[#allocation3] sm:$0x3] %vm265_vm3, %v636_v0  ;;  %vm340_vm5 = vcmask 9216   ;;  %v639_v17 = vmov 0  }
   0xf   : > { %v279_v1 = vld [vmem:[%s245_s19] sm:$0x3]  ;;  %v330_v8 = vshrl.u32 %v329_v7, 7  ;;  %v334_v9 = vand.u32 127, %v329_v7  ;;  %604 = vset.pattern.permute.xlu0 %v639_v17  ;;  %605 = vset.pattern.permute.xlu1 %v639_v17  ;;  %s252_s25 = scalar_lea.vmem %s716_s2, %s679_s16  ;;  %vm378_vm6 = vcmask 1040384   ;;  %vm374_vm7 = vcmask 15360   ;;  %s259_s28 = scalar_lea.vmem %s717_s3, %s679_s16 }
  0x10   : > { %v280_v2 = vpack.c.bf16 %v279_v1, %v279_v1  ;;  %v277_v4 = vld [vmem:[%s238_s22] sm:$0x3] }
  0x11   : > { %v278_v5 = vpack.c.bf16 %v277_v4, %v277_v4  ;;  %vm337_vm4 = vcmp.le.s32.totalorder %v334_v9, %v330_v8  ;;  %v372_v22 = vld [vmem:[%s252_s25] sm:$0x3] }
  0x12   : > { %v286_v3 = vsel %vm281_vm2, %v280_v2, 0  ;;  %v373_v23 = vpack.c.bf16 %v372_v22, %v372_v22 }
  0x13   : > { %565 = vmatpush3.bf16.xpose.msra.mxu0 %v286_v3 }
  0x14   : > { %v380_v24 = vsel %vm378_vm6, %v373_v23, 0  ;;  %v364_v39 = vld [vmem:[#allocation4] sm:$0x3] }
  0x15   : > { %v339_v18 = vld [vmem:[#allocation2] sm:$0x3]  ;;  %571 = vmatpush3.bf16.msra.mxu1 %v380_v24  ;;  %v356_v33 = vld [vmem:[#allocation3] sm:$0x3] }
  0x1a   : > { %567 = vmatmul.mubr.msk.bf16.vlgmr.msra.gmra.mxu0 %vm281_vm2, %v278_v5 }
  0xda   : > { %v322_v10 = vpop.f32.mrf.mxu0 }
  0xdb   : > { %v328_v11 = vmul.f32 0.35355338, %v322_v10 }
  0xdc   : > { %v568_v12 = vpop.f32.mrf.mxu0 }
  0xdd   : > { %v338_v13 = vsel %vm337_vm4, %v328_v11, -1e+30 }
  0xde   : > { %v325_v14 = vpop.f32.mrf.mxu0  ;;  %v341_v15 = vsel %vm340_vm5, %v338_v13, -inf }
  0xdf   : > { %342 = vmax.xlane.f32.xlu0 %v341_v15 }
  0xe0   : > { %v569_v16 = vpop.f32.mrf.mxu0 }
 0x168   : > { %v343_v19 = vpop.xlane.xlu0 %342 }
 0x169   : > { %v344_v20 = vmax.f32 %v339_v18, %v343_v19 }
 0x16b   : > { %v345_v21 = vsub.f32 %v339_v18, %v344_v20  ;;  %425 = vst.msk [vmem:[#allocation2] sm:$0x3] %vm265_vm3, %v344_v20  ;;  %350 = vperm.xlu0 %604, %v344_v20  }
 0x16d   : > { %v346_v29 = vmul.f32 1.442695, %v345_v21 }
 0x1e6   : > { %v351_v25 = vpop.permute.xlu0 %350 }
 0x1e7   : > { %v353_v26 = vsub.f32 %v338_v13, %v351_v25 }
 0x1e9   : > { %v354_v27 = vmul.f32 1.442695, %v353_v26 }
 0x1eb   : > { %606 = vpow2.f32 %v354_v27 }
 0x1ec   : > { %608 = vpow2.f32 %v346_v29 }
 0x1f8   : > { %v607_v28 = vpop.eup %606 }
 0x1f9   : > { %v358_v30 = vsel %vm340_vm5, %v607_v28, 0.0  ;;  %v371_v31 = vpack.c.bf16 %v607_v28, %v607_v28  ;;  %v609_v32 = vpop.eup %608 }
 0x1fa   : > { %359 = vadd.xlane.f32.xlu1 %v358_v30  ;;  %v357_v34 = vmul.f32 %v609_v32, %v356_v33 }
 0x1fb   : > { %573 = vmatmul.mubr.msk.bf16.vlgmr.msra.gmra.mxu1 %vm374_vm7, %v371_v31 }
 0x20b   : > { %367 = vperm.xlu1 %605, %v609_v32  }
 0x283   : > { %v360_v35 = vpop.xlane.xlu1 %359 }
 0x284   : > { %v361_v36 = vadd.f32 %v360_v35, %v357_v34 }
 0x286   : > { %363 = vst.msk [vmem:[#allocation3] sm:$0x3] %vm265_vm3, %v361_v36 }
 0x287   : > { %v368_v40 = vpop.permute.xlu1 %367 }
 0x288   : > { %v370_v41 = vmul.f32 %v368_v40, %v364_v39 }
 0x28d   : > { %v430_v37 = vld [vmem:[#allocation3] sm:$0x3] }
 0x28e   : > { %610 = vrcp.f32 %v430_v37 }
 0x29b   : > { %v611_v38 = vpop.eup %610 }
 0x29c   : > { %434 = vperm.xlu1 %605, %v611_v38  }
 0x2bb   : > { %v416_v42 = vpop.f32.mrf.mxu1 }
 0x2bc   : > { %v422_v43 = vadd.f32 %v416_v42, %v370_v41 }
 0x2bd   : > { %v574_v44 = vpop.f32.mrf.mxu1 }
 0x2be   : > { %424 = vst.msk [vmem:[#allocation4] sm:$0x3] %vm268_vm0, %v422_v43 }
 0x2bf   : > { %v419_v45 = vpop.f32.mrf.mxu1 }
 0x2c1   : > { %v575_v46 = vpop.f32.mrf.mxu1 }
 0x2c5   : > { %v429_v47 = vld [vmem:[#allocation4] sm:$0x3] }
 0x317   : > { %v435_v48 = vpop.permute.xlu1 %434 }
 0x318   : > { %v437_v49 = vmul.f32 %v435_v48, %v429_v47 }
 0x31a   : > { %439 = vst.msk [vmem:[%s259_s28] sm:$0x3] %vm268_vm0, %v437_v49 }
 0x31b PF: > { %s13_s14 = sadd.s32 1, %s634_s14   ;;  %s718_s12 = smov %s630_s13 }
 0x31c   : > { %p10_p5 = scmp.ge.s32.totalorder %s13_s14, 130   ;;  %s719_s13 = smov %s721_s15 }
 0x31e   :  { %12 = sbr.rel (!%p10_p5) target bundleno = 2 (0x2), region = 80 }

// kernel: gpt_forward.28
= control target key start
LH: loop header
LB: loop body
LE: loop exit
PB: predicated region body
PF: predicated region fallthrough
CT: control target
= control target key end

     0   :  { %vm19_vm0 = vcmask 261120   ;;  %v228_v1 = vmov 0.0   ;;  %s355_s1 = inlined_call_operand.vmem [shape: bf16[32,32], index: 1, kind: input, shape index: {}]   ;;  %s356_s0 = inlined_call_operand.vmem [shape: f32[64,32], index: 0, kind: input, shape index: {}]   ;;  %s357_s2 = inlined_call_operand.vmem [shape: f32[64,32], index: 2, kind: input, shape index: {}]   ;;  %s358_s3 = inlined_call_operand.vmem [shape: f32[64,32], index: 3, kind: output, shape index: {}]  }
   0x1   :  { %v226_v0 = vld [vmem:[%s355_s1 + $0x8] sm:$0xff]   ;;  %22 = vst.msk [vmem:[#allocation2 + $0x10] sm:$0xff] %vm19_vm0, %v228_v1  ;;  %20 = vst.msk [vmem:[#allocation2] sm:$0xff] %vm19_vm0, %v228_v1  ;;  %v227_v2 = vld [vmem:[%s355_s1] sm:$0xff]  }
   0x2   :  { %21 = vst.msk [vmem:[#allocation2 + $0x8] sm:$0xff] %vm19_vm0, %v228_v1  ;;  %23 = vst.msk [vmem:[#allocation2 + $0x18] sm:$0xff] %vm19_vm0, %v228_v1  ;;  %209 = vmatprep.subr.bf16.mxu0 %v226_v0  ;;  %221 = vmatprep.subr.bf16.mxu1 %v226_v0  ;;  %v36_v3 = vld [vmem:[%s356_s0] sm:$0xff]  ;;  %v37_v4 = vld [vmem:[%s356_s0 + $0x8] sm:$0xff] }
   0x3   :  { %24 = vst.msk [vmem:[#allocation2 + $0x20] sm:$0xff] %vm19_vm0, %v228_v1  ;;  %25 = vst.msk [vmem:[#allocation2 + $0x28] sm:$0xff] %vm19_vm0, %v228_v1  ;;  %v40_v5 = vld [vmem:[%s356_s0 + $0x20] sm:$0xff]  ;;  %210 = vmatpush3.bf16.msra.mxu0 %v226_v0  ;;  %223 = vmatpush3.bf16.msra.mxu1 %v226_v0  ;;  %v44_v6 = vpack.c.bf16 %v37_v4, %v36_v3  ;;  %v41_v7 = vld [vmem:[%s356_s0 + $0x28] sm:$0xff] }
   0x4   :  { %26 = vst.msk [vmem:[#allocation2 + $0x30] sm:$0xff] %vm19_vm0, %v228_v1  ;;  %27 = vst.msk [vmem:[#allocation2 + $0x38] sm:$0xff] %vm19_vm0, %v228_v1  ;;  %v38_v8 = vld [vmem:[%s356_s0 + $0x10] sm:$0xff]  ;;  %v39_v9 = vld [vmem:[%s356_s0 + $0x18] sm:$0xff]  ;;  %211 = vmatprep.subr.bf16.mxu0 %v227_v2  ;;  %222 = vmatprep.subr.bf16.mxu1 %v227_v2  ;;  %v46_v10 = vpack.c.bf16 %v41_v7, %v40_v5 }
   0x5   :  { %v42_v11 = vld [vmem:[%s356_s0 + $0x30] sm:$0xff]  ;;  %v43_v12 = vld [vmem:[%s356_s0 + $0x38] sm:$0xff]  ;;  %213 = vmatprep.mubr.msk.bf16.mxu0 %vm19_vm0, %v44_v6  ;;  %v45_v13 = vpack.c.bf16 %v39_v9, %v38_v8  ;;  %v161_v41 = vld [vmem:[%s357_s2] sm:$0xff] }
   0x6   :  { %217 = vmatprep.mubr.msk.bf16.mxu1 %vm19_vm0, %v46_v10  ;;  %v47_v14 = vpack.c.bf16 %v43_v12, %v42_v11  ;;  %v163_v39 = vld [vmem:[%s357_s2 + $0x10] sm:$0xff]  ;;  %v165_v44 = vld [vmem:[%s357_s2 + $0x20] sm:$0xff]  ;;  %v164_v47 = vld [vmem:[%s357_s2 + $0x18] sm:$0xff] }
   0x7   :  { %212 = vmatpush3.bf16.msra.mxu0 %v227_v2  ;;  %224 = vmatpush3.bf16.msra.mxu1 %v227_v2  ;;  %v167_v40 = vld [vmem:[%s357_s2 + $0x30] sm:$0xff]  ;;  %v168_v50 = vld [vmem:[%s357_s2 + $0x38] sm:$0xff]  ;;  %v162_v53 = vld [vmem:[%s357_s2 + $0x8] sm:$0xff] }
   0x8   :  { %v30_v15 = vld [vmem:[#allocation2 + $0x10] sm:$0xff]  ;;  %v28_v19 = vld [vmem:[#allocation2] sm:$0xff]  ;;  %v166_v56 = vld [vmem:[%s357_s2 + $0x28] sm:$0xff] }
   0x9   :  { %v31_v25 = vld [vmem:[#allocation2 + $0x18] sm:$0xff]  ;;  %v29_v31 = vld [vmem:[#allocation2 + $0x8] sm:$0xff] }
   0xa   :  { %214 = vmatmul.mubr.msk.bf16.vlgmr.msra.gmra.mxu0 %vm19_vm0, %v45_v13  ;;  %218 = vmatmul.mubr.msk.bf16.vlgmr.msra.gmra.mxu1 %vm19_vm0, %v47_v14  ;;  %v32_v20 = vld [vmem:[#allocation2 + $0x20] sm:$0xff]  ;;  %v33_v32 = vld [vmem:[#allocation2 + $0x28] sm:$0xff] }
   0xb   :  { %v34_v16 = vld [vmem:[#allocation2 + $0x30] sm:$0xff]  ;;  %v35_v26 = vld [vmem:[#allocation2 + $0x38] sm:$0xff] }
  0xca   :  { %v215_v17 = vpop.f32.mrf.mxu0  ;;  %v219_v18 = vpop.f32.mrf.mxu1 }
  0xcb   :  { %v144_v21 = vadd.f32 %v215_v17, %v30_v15  ;;  %v148_v22 = vadd.f32 %v219_v18, %v34_v16 }
  0xcc   :  { %v111_v23 = vpop.f32.mrf.mxu0  ;;  %v127_v24 = vpop.f32.mrf.mxu1 }
  0xcd   :  { %152 = vst.msk [vmem:[#allocation2 + $0x10] sm:$0xff] %vm19_vm0, %v144_v21  ;;  %156 = vst.msk [vmem:[#allocation2 + $0x30] sm:$0xff] %vm19_vm0, %v148_v22  ;;  %v142_v27 = vadd.f32 %v111_v23, %v28_v19  ;;  %v146_v28 = vadd.f32 %v127_v24, %v32_v20 }
  0xce   :  { %v216_v29 = vpop.f32.mrf.mxu0  ;;  %v220_v30 = vpop.f32.mrf.mxu1 }
  0xcf   :  { %150 = vst.msk [vmem:[#allocation2] sm:$0xff] %vm19_vm0, %v142_v27  ;;  %154 = vst.msk [vmem:[#allocation2 + $0x20] sm:$0xff] %vm19_vm0, %v146_v28  ;;  %v145_v33 = vadd.f32 %v216_v29, %v31_v25  ;;  %v149_v34 = vadd.f32 %v220_v30, %v35_v26 }
  0xd0   :  { %v114_v35 = vpop.f32.mrf.mxu0  ;;  %v130_v36 = vpop.f32.mrf.mxu1 }
  0xd1   :  { %153 = vst.msk [vmem:[#allocation2 + $0x18] sm:$0xff] %vm19_vm0, %v145_v33  ;;  %157 = vst.msk [vmem:[#allocation2 + $0x38] sm:$0xff] %vm19_vm0, %v149_v34  ;;  %v143_v37 = vadd.f32 %v114_v35, %v29_v31  ;;  %v147_v38 = vadd.f32 %v130_v36, %v33_v32 }
  0xd3   :  { %151 = vst.msk [vmem:[#allocation2 + $0x8] sm:$0xff] %vm19_vm0, %v143_v37  ;;  %155 = vst.msk [vmem:[#allocation2 + $0x28] sm:$0xff] %vm19_vm0, %v147_v38 }
  0xd4   :  { %v171_v42 = vld [vmem:[#allocation2 + $0x10] sm:$0xff] }
  0xd5   :  { %v175_v43 = vld [vmem:[#allocation2 + $0x30] sm:$0xff]  ;;  %v179_v45 = vadd.f32 %v171_v42, %v163_v39 }
  0xd6   :  { %v183_v46 = vadd.f32 %v175_v43, %v167_v40  ;;  %v169_v48 = vld [vmem:[#allocation2] sm:$0xff] }
  0xd7   :  { %v173_v49 = vld [vmem:[#allocation2 + $0x20] sm:$0xff]  ;;  %187 = vst.msk [vmem:[%s358_s3 + $0x10] sm:$0xff] %vm19_vm0, %v179_v45  ;;  %v177_v51 = vadd.f32 %v169_v48, %v161_v41 }
  0xd8   :  { %191 = vst.msk [vmem:[%s358_s3 + $0x30] sm:$0xff] %vm19_vm0, %v183_v46  ;;  %v181_v52 = vadd.f32 %v173_v49, %v165_v44  ;;  %v172_v54 = vld [vmem:[#allocation2 + $0x18] sm:$0xff] }
  0xd9   :  { %v176_v55 = vld [vmem:[#allocation2 + $0x38] sm:$0xff]  ;;  %185 = vst.msk [vmem:[%s358_s3] sm:$0xff] %vm19_vm0, %v177_v51  ;;  %v180_v57 = vadd.f32 %v172_v54, %v164_v47 }
  0xda   :  { %189 = vst.msk [vmem:[%s358_s3 + $0x20] sm:$0xff] %vm19_vm0, %v181_v52  ;;  %v184_v58 = vadd.f32 %v176_v55, %v168_v50  ;;  %v170_v59 = vld [vmem:[#allocation2 + $0x8] sm:$0xff] }
  0xdb   :  { %v174_v60 = vld [vmem:[#allocation2 + $0x28] sm:$0xff]  ;;  %188 = vst.msk [vmem:[%s358_s3 + $0x18] sm:$0xff] %vm19_vm0, %v180_v57  ;;  %v178_v61 = vadd.f32 %v170_v59, %v162_v53 }
  0xdc   :  { %192 = vst.msk [vmem:[%s358_s3 + $0x38] sm:$0xff] %vm19_vm0, %v184_v58  ;;  %v182_v62 = vadd.f32 %v174_v60, %v166_v56 }
  0xdd   :  { %186 = vst.msk [vmem:[%s358_s3 + $0x8] sm:$0xff] %vm19_vm0, %v178_v61 }
  0xde   :  { %190 = vst.msk [vmem:[%s358_s3 + $0x28] sm:$0xff] %vm19_vm0, %v182_v62 }

// kernel: gpt_forward.34
= control target key start
LH: loop header
LB: loop body
LE: loop exit
PB: predicated region body
PF: predicated region fallthrough
CT: control target
= control target key end

     0   :  { %vm21_vm0 = vcmask 261120   ;;  %s244_s0 = inlined_call_operand.vmem [shape: f32[32,32], index: 0, kind: input, shape index: {}]   ;;  %s245_s1 = inlined_call_operand.vmem [shape: bf16[32,32], index: 1, kind: input, shape index: {}]   ;;  %s246_s2 = inlined_call_operand.hbm [shape: f32[32,32], index: 2, kind: output, shape index: {}]  }
   0x1   :  { %v15_v0 = vld [vmem:[%s244_s0 + $0x10] sm:$0xff]  ;;  %v13_v1 = vld [vmem:[%s244_s0] sm:$0xff]  ;;  %v16_v2 = vld [vmem:[%s244_s0 + $0x18] sm:$0xff] }
   0x2   :  { %v19_v3 = vmul.f32 %v15_v0, %v15_v0  ;;  %v17_v4 = vmul.f32 %v13_v1, %v13_v1  ;;  %v20_v5 = vmul.f32 %v16_v2, %v16_v2  ;;  %v14_v6 = vld [vmem:[%s244_s0 + $0x8] sm:$0xff] }
   0x3   :  { %v18_v7 = vmul.f32 %v14_v6, %v14_v6 }
   0x4   :  { %7 = vsyncpa [#allocation3], 0  ;;  %v28_v8 = vsel %vm21_vm0, %v19_v3, 0.0  ;;  %v22_v9 = vsel %vm21_vm0, %v17_v4, 0.0  ;;  %v31_v10 = vsel %vm21_vm0, %v20_v5, 0.0  ;;  %v163_v12 = vld [vmem:[%s245_s1 + $0x8] sm:$0xff]  }
   0x5   :  { %29 = vadd.xlane.f32.xlu1 %v28_v8  ;;  %23 = vadd.xlane.f32.xlu0 %v22_v9  ;;  %v25_v11 = vsel %vm21_vm0, %v18_v7, 0.0  ;;  %v164_v13 = vld [vmem:[%s245_s1] sm:$0xff]   ;;  %s195_s1 = smov [#allocation2]  }
   0x6   :  { %152 = vmatprep.subr.bf16.mxu0 %v163_v12  ;;  %s133_s20 = sshll.u32 %s195_s1, 4  ;;  %s134_s20 = int_to_ptr.vmem [resolvable:$true] %s133_s20 }
   0x7   :  { %153 = vmatpush3.bf16.msra.mxu0 %v163_v12  ;;  %s173_s21 = scalar_lea.vmem %s134_s20, 512  ;;  %p178_p1 = scmp.lt.s32.totalorder %s134_s20, %s134_s20 }
   0x8   :  { %154 = vmatprep.subr.bf16.mxu0 %v164_v13  ;;  %p174_p0 = scmp.ne.s32.totalorder %s134_s20, %s173_s21  ;;  %p179_p2 = scmp.lt.s32.totalorder %s173_s21, %s173_s21 }
   0x9   :  { %32 = vadd.xlane.f32.xlu1 %v31_v10  ;;  %26 = vadd.xlane.f32.xlu0 %v25_v11 }
   0xa   :  { %p180_p3 = por %p179_p2, %p178_p1 }
   0xb   :  { %155 = vmatpush3.bf16.msra.mxu0 %v164_v13 }
   0xc   :  { %p181_p4 = pnand %p180_p3, %p174_p0 }
  0x8e   :  { %v30_v14 = vpop.xlane.xlu1 %29  ;;  %v24_v15 = vpop.xlane.xlu0 %23 }
  0x8f   :  { %v37_v16 = vmul.f32 0.03125, %v30_v14  ;;  %v35_v17 = vmul.f32 0.03125, %v24_v15 }
  0x91   :  { %v41_v18 = vadd.f32 1e-05, %v37_v16  ;;  %v39_v19 = vadd.f32 1e-05, %v35_v17 }
  0x92   :  { %v33_v20 = vpop.xlane.xlu1 %32  ;;  %v27_v21 = vpop.xlane.xlu0 %26 }
  0x93   :  { %v38_v22 = vmul.f32 0.03125, %v33_v20  ;;  %v36_v23 = vmul.f32 0.03125, %v27_v21  ;;  %165 = vrsqrt.f32 %v41_v18 }
  0x94   :  { %167 = vrsqrt.f32 %v39_v19 }
  0x95   :  { %v42_v24 = vadd.f32 1e-05, %v38_v22  ;;  %v40_v25 = vadd.f32 1e-05, %v36_v23 }
  0x97   :  { %169 = vrsqrt.f32 %v42_v24 }
  0x98   :  { %171 = vrsqrt.f32 %v40_v25 }
  0xa0   :  { %v166_v26 = vpop.eup %165 }
  0xa1   :  { %v168_v27 = vpop.eup %167  ;;  %v49_v30 = vmul.f32 %v166_v26, %v15_v0 }
  0xa2   :  { %v47_v32 = vmul.f32 %v168_v27, %v13_v1 }
  0xa4   :  { %v170_v28 = vpop.eup %169 }
  0xa5   :  { %v172_v29 = vpop.eup %171  ;;  %v50_v31 = vmul.f32 %v170_v28, %v16_v2 }
  0xa6   :  { %v48_v33 = vmul.f32 %v172_v29, %v14_v6 }
  0xa7   :  { %v52_v34 = vpack.c.bf16 %v50_v31, %v49_v30 }
  0xa8   :  { %v51_v35 = vpack.c.bf16 %v48_v33, %v47_v32 }
  0xaa   :  { %156 = vmatprep.mubr.msk.bf16.mxu0 %vm21_vm0, %v51_v35 }
  0xab   :  { %157 = vmatmul.mubr.msk.bf16.vlgmr.msra.gmra.mxu0 %vm21_vm0, %v52_v34 }
 0x16b   :  { %v158_v36 = vpop.f32.mrf.mxu0 }
 0x16c   :  { %126 = vst.msk [vmem:[#allocation2 + $0x10] sm:$0xff] %vm21_vm0, %v158_v36 }
 0x16d   :  { %v109_v37 = vpop.f32.mrf.mxu0 }
 0x16e   :  { %124 = vst.msk [vmem:[#allocation2] sm:$0xff] %vm21_vm0, %v109_v37 }
 0x16f   :  { %v159_v38 = vpop.f32.mrf.mxu0 }
 0x170   :  { %127 = vst.msk [vmem:[#allocation2 + $0x18] sm:$0xff] %vm21_vm0, %v159_v38 }
 0x171   :  { %v112_v39 = vpop.f32.mrf.mxu0 }
 0x172   :  { %125 = vst.msk [vmem:[#allocation2 + $0x8] sm:$0xff] %vm21_vm0, %v112_v39 }
 0x173   :  { %184 = shalt.err (!%p181_p4)
}
 0x174   :  { %s196_s22 = smov 128   ;;  %s197_s23 = smov 8  }
 0x175   :  { %139 = dma.vmem_to_hbm [thread:$0]  %s134_s20, 512, %s246_s2, [#allocation3], %s196_s22, %s196_s22, %s197_s23  }
 0x176   :  { %193 = dma.done.wait [#allocation3], 512  }
 0x177   :  { %194 = vsyncadd [#allocation3], 4294966784 }
 0x178   :  { %143 = vsyncpa [#allocation3], 1 }

// kernel: gpt_forward.29
= control target key start
LH: loop header
LB: loop body
LE: loop exit
PB: predicated region body
PF: predicated region fallthrough
CT: control target
= control target key end

     0   :  { %vm22_vm0 = vcmask 261120   ;;  %vm399_vm1 = vcmask 785408   ;;  %s879_s0 = inlined_call_operand.vmem [shape: f32[64,32], index: 0, kind: input, shape index: {}]   ;;  %s880_s1 = inlined_call_operand.vmem [shape: bf16[32,96], index: 1, kind: input, shape index: {}]   ;;  %s881_s2 = inlined_call_operand.vmem [shape: bf16[32,96], index: 2, kind: input, shape index: {}]   ;;  %s882_s3 = inlined_call_operand.vmem [shape: bf16[96,32], index: 3, kind: input, shape index: {}]   ;;  %s883_s4 = inlined_call_operand.vmem [shape: f32[64,32], index: 4, kind: output, shape index: {}]  }
   0x1   :  { %v700_v0 = vld [vmem:[%s879_s0 + $0x10] sm:$0xff]  ;;  %v705_v1 = vld [vmem:[%s879_s0] sm:$0xff]  ;;  %v710_v2 = vld [vmem:[%s879_s0 + $0x18] sm:$0xff] }
   0x2   :  { %v41_v3 = vmul.f32 %v700_v0, %v700_v0  ;;  %v39_v4 = vmul.f32 %v705_v1, %v705_v1  ;;  %v42_v5 = vmul.f32 %v710_v2, %v710_v2  ;;  %v721_v6 = vld [vmem:[%s879_s0 + $0x8] sm:$0xff]  ;;  %v733_v9 = vld [vmem:[%s879_s0 + $0x20] sm:$0xff]  ;;  %v746_v16 = vld [vmem:[%s879_s0 + $0x38] sm:$0xff] }
   0x3   :  { %v40_v7 = vmul.f32 %v721_v6, %v721_v6  ;;  %v728_v8 = vld [vmem:[%s879_s0 + $0x28] sm:$0xff]  ;;  %v43_v15 = vmul.f32 %v733_v9, %v733_v9  ;;  %v751_v17 = vld [vmem:[%s879_s0 + $0x30] sm:$0xff]  ;;  %v46_v20 = vmul.f32 %v746_v16, %v746_v16  ;;  %v614_v25 = vld [vmem:[%s880_s1] sm:$0xff]  }
   0x4   :  { %v54_v10 = vsel %vm22_vm0, %v41_v3, 0.0  ;;  %v48_v11 = vsel %vm22_vm0, %v39_v4, 0.0  ;;  %v57_v12 = vsel %vm22_vm0, %v42_v5, 0.0  ;;  %v44_v14 = vmul.f32 %v728_v8, %v728_v8  ;;  %v613_v24 = vld [vmem:[%s880_s1 + $0x8] sm:$0xff]   ;;  %v616_v3 = vld [vmem:[%s881_s2] sm:$0xff]  }
   0x5   :  { %55 = vadd.xlane.f32.xlu1 %v54_v10  ;;  %49 = vadd.xlane.f32.xlu0 %v48_v11  ;;  %v51_v13 = vsel %vm22_vm0, %v40_v7, 0.0  ;;  %v60_v19 = vsel %vm22_vm0, %v43_v15, 0.0  ;;  %v45_v21 = vmul.f32 %v751_v17, %v751_v17  ;;  %v69_v22 = vsel %vm22_vm0, %v46_v20, 0.0  ;;  %v615_v26 = vld [vmem:[%s881_s2 + $0x8] sm:$0xff]   ;;  %v618_v15 = vld [vmem:[%s882_s3 + $0x20] sm:$0xff]  }
   0x6   :  { %v63_v18 = vsel %vm22_vm0, %v44_v14, 0.0  ;;  %568 = vmatprep.subr.bf16.mxu1 %v613_v24  ;;  %v617_v14 = vld [vmem:[%s882_s3 + $0x28] sm:$0xff]  }
   0x7   :  { %v66_v23 = vsel %vm22_vm0, %v45_v21, 0.0  ;;  %569 = vmatpush3.bf16.msra.mxu1 %v613_v24  ;;  %592 = vmatprep.subr.bf16.mxu0 %v617_v14  ;;  %v621_v20 = vld [vmem:[%s882_s3 + $0x8] sm:$0xff]   ;;  %v622_v21 = vld [vmem:[%s882_s3] sm:$0xff]  }
   0x8   :  { %570 = vmatprep.subr.bf16.mxu1 %v614_v25  ;;  %593 = vmatpush3.bf16.msra.mxu0 %v617_v14 }
   0x9   :  { %58 = vadd.xlane.f32.xlu1 %v57_v12  ;;  %52 = vadd.xlane.f32.xlu0 %v51_v13 }
   0xa   :  { %594 = vmatprep.subr.bf16.mxu0 %v618_v15 }
   0xb   :  { %571 = vmatpush3.bf16.msra.mxu1 %v614_v25 }
   0xc   :  { %580 = vmatprep.subr.bf16.mxu1 %v615_v26  ;;  %595 = vmatpush3.bf16.msra.mxu0 %v618_v15 }
   0xd   :  { %64 = vadd.xlane.f32.xlu1 %v63_v18  ;;  %61 = vadd.xlane.f32.xlu0 %v60_v19  ;;  %v619_v18 = vld [vmem:[%s882_s3 + $0x18] sm:$0xff]   ;;  %v620_v19 = vld [vmem:[%s882_s3 + $0x10] sm:$0xff]  }
   0xe   :  { %596 = vmatprep.subr.bf16.mxu0 %v619_v18 }
  0x10   :  { %597 = vmatpush3.bf16.msra.mxu0 %v619_v18 }
  0x11   :  { %70 = vadd.xlane.f32.xlu1 %v69_v22  ;;  %67 = vadd.xlane.f32.xlu0 %v66_v23  ;;  %v671_v22 = vmov 0.0  }
  0x12   :  { %598 = vmatprep.subr.bf16.mxu0 %v620_v19  ;;  %25 = vst.msk [vmem:[#allocation2 + $0x10] sm:$0xff] %vm22_vm0, %v671_v22  ;;  %23 = vst.msk [vmem:[#allocation2] sm:$0xff] %vm22_vm0, %v671_v22 }
  0x13   :  { %24 = vst.msk [vmem:[#allocation2 + $0x8] sm:$0xff] %vm22_vm0, %v671_v22  ;;  %26 = vst.msk [vmem:[#allocation2 + $0x18] sm:$0xff] %vm22_vm0, %v671_v22 }
  0x14   :  { %599 = vmatpush3.bf16.msra.mxu0 %v620_v19  ;;  %27 = vst.msk [vmem:[#allocation2 + $0x20] sm:$0xff] %vm22_vm0, %v671_v22  ;;  %28 = vst.msk [vmem:[#allocation2 + $0x28] sm:$0xff] %vm22_vm0, %v671_v22 }
  0x15   :  { %600 = vmatprep.subr.bf16.mxu0 %v621_v20  ;;  %29 = vst.msk [vmem:[#allocation2 + $0x30] sm:$0xff] %vm22_vm0, %v671_v22  ;;  %30 = vst.msk [vmem:[#allocation2 + $0x38] sm:$0xff] %vm22_vm0, %v671_v22 }
  0x18   :  { %601 = vmatpush3.bf16.msra.mxu0 %v621_v20 }
  0x19   :  { %602 = vmatprep.subr.bf16.mxu0 %v622_v21 }
  0x1c   :  { %603 = vmatpush3.bf16.msra.mxu0 %v622_v21 }
  0x8e   :  { %v56_v27 = vpop.xlane.xlu1 %55  ;;  %v50_v28 = vpop.xlane.xlu0 %49 }
  0x8f   :  { %v75_v29 = vmul.f32 0.03125, %v56_v27  ;;  %v73_v30 = vmul.f32 0.03125, %v50_v28 }
  0x91   :  { %v83_v31 = vadd.f32 1e-05, %v75_v29  ;;  %v81_v32 = vadd.f32 1e-05, %v73_v30 }
  0x92   :  { %v59_v33 = vpop.xlane.xlu1 %58  ;;  %v53_v34 = vpop.xlane.xlu0 %52 }
  0x93   :  { %v76_v35 = vmul.f32 0.03125, %v59_v33  ;;  %v74_v36 = vmul.f32 0.03125, %v53_v34  ;;  %623 = vrsqrt.f32 %v83_v31 }
  0x94   :  { %625 = vrsqrt.f32 %v81_v32 }
  0x95   :  { %v84_v37 = vadd.f32 1e-05, %v76_v35  ;;  %v82_v38 = vadd.f32 1e-05, %v74_v36 }
  0x96   :  { %v65_v39 = vpop.xlane.xlu1 %64  ;;  %v62_v40 = vpop.xlane.xlu0 %61 }
  0x97   :  { %627 = vrsqrt.f32 %v84_v37  ;;  %v78_v41 = vmul.f32 0.03125, %v65_v39  ;;  %v77_v42 = vmul.f32 0.03125, %v62_v40 }
  0x98   :  { %629 = vrsqrt.f32 %v82_v38 }
  0x99   :  { %v86_v43 = vadd.f32 1e-05, %v78_v41  ;;  %v85_v44 = vadd.f32 1e-05, %v77_v42 }
  0x9a   :  { %v71_v45 = vpop.xlane.xlu1 %70  ;;  %v68_v46 = vpop.xlane.xlu0 %67 }
  0x9b   :  { %631 = vrsqrt.f32 %v86_v43  ;;  %v80_v47 = vmul.f32 0.03125, %v71_v45  ;;  %v79_v48 = vmul.f32 0.03125, %v68_v46 }
  0x9c   :  { %633 = vrsqrt.f32 %v85_v44 }
  0x9d   :  { %v88_v49 = vadd.f32 1e-05, %v80_v47  ;;  %v87_v50 = vadd.f32 1e-05, %v79_v48 }
  0x9f   :  { %635 = vrsqrt.f32 %v88_v49 }
  0xa0   :  { %637 = vrsqrt.f32 %v87_v50  ;;  %v624_v51 = vpop.eup %623 }
  0xa1   :  { %v626_v52 = vpop.eup %625  ;;  %v99_v55 = vmul.f32 %v624_v51, %v700_v0 }
  0xa2   :  { %v97_v57 = vmul.f32 %v626_v52, %v705_v1 }
  0xa4   :  { %v628_v53 = vpop.eup %627 }
  0xa5   :  { %v630_v54 = vpop.eup %629  ;;  %v100_v56 = vmul.f32 %v628_v53, %v710_v2 }
  0xa6   :  { %v98_v58 = vmul.f32 %v630_v54, %v721_v6 }
  0xa7   :  { %v106_v59 = vpack.c.bf16 %v100_v56, %v99_v55 }
  0xa8   :  { %v632_v60 = vpop.eup %631  ;;  %v105_v61 = vpack.c.bf16 %v98_v58, %v97_v57 }
  0xa9   :  { %v634_v62 = vpop.eup %633  ;;  %v102_v63 = vmul.f32 %v632_v60, %v728_v8 }
  0xaa   :  { %572 = vmatprep.mubr.msk.bf16.mxu1 %vm22_vm0, %v105_v61  ;;  %v101_v4 = vmul.f32 %v634_v62, %v733_v9 }
  0xab   :  { %573 = vmatmul.mubr.msk.bf16.vlgmr.msra.gmra.mxu1 %vm22_vm0, %v106_v59 }
  0xac   :  { %v636_v5 = vpop.eup %635  ;;  %v107_v7 = vpack.c.bf16 %v102_v63, %v101_v4  ;;  %581 = vmatpush3.bf16.msra.mxu1 %v615_v26 }
  0xad   :  { %v638_v10 = vpop.eup %637  ;;  %v104_v11 = vmul.f32 %v636_v5, %v746_v16  ;;  %582 = vmatprep.subr.bf16.mxu1 %v616_v3 }
  0xae   :  { %576 = vmatprep.mubr.msk.bf16.mxu1 %vm22_vm0, %v107_v7  ;;  %v103_v12 = vmul.f32 %v638_v10, %v751_v17 }
  0xb0   :  { %v108_v13 = vpack.c.bf16 %v104_v11, %v103_v12  ;;  %583 = vmatpush3.bf16.msra.mxu1 %v616_v3 }
  0xb3   :  { %577 = vmatmul.mubr.msk.bf16.gmra.mxu1 %vm22_vm0, %v108_v13 }
  0xb4   :  { %584 = vmatprep.mubr.msk.bf16.mxu1 %vm22_vm0, %v105_v61 }
  0xbb   :  { %585 = vmatmul.mubr.msk.bf16.vlgmr.msra.gmra.mxu1 %vm22_vm0, %v106_v59 }
  0xbc   :  { %588 = vmatprep.mubr.msk.bf16.mxu1 %vm22_vm0, %v107_v7 }
  0xc3   :  { %589 = vmatmul.mubr.msk.bf16.gmra.mxu1 %vm22_vm0, %v108_v13 }
 0x16b   :  { %v815_v23 = vpop.f32.mrf.mxu1 }
 0x16c   :  { %v285_v24 = vsub.f32 0.0, %v815_v23 }
 0x16d   :  { %v171_v25 = vpop.f32.mrf.mxu1 }
 0x16e   :  { %v295_v26 = vmul.f32 1.442695, %v285_v24  ;;  %v283_v27 = vsub.f32 0.0, %v171_v25 }
 0x16f   :  { %v575_v28 = vpop.f32.mrf.mxu1 }
 0x170   :  { %639 = vpow2.f32 %v295_v26  ;;  %v291_v29 = vmul.f32 1.442695, %v283_v27  ;;  %v286_v30 = vsub.f32 0.0, %v575_v28 }
 0x171   :  { %v174_v31 = vpop.f32.mrf.mxu1 }
 0x172   :  { %641 = vpow2.f32 %v291_v29  ;;  %v297_v32 = vmul.f32 1.442695, %v286_v30  ;;  %v284_v33 = vsub.f32 0.0, %v174_v31 }
 0x173   :  { %v818_v34 = vpop.f32.mrf.mxu1 }
 0x174   :  { %643 = vpow2.f32 %v297_v32  ;;  %v293_v35 = vmul.f32 1.442695, %v284_v33  ;;  %v289_v36 = vsub.f32 0.0, %v818_v34 }
 0x175   :  { %v821_v37 = vpop.f32.mrf.mxu1 }
 0x176   :  { %645 = vpow2.f32 %v293_v35  ;;  %v303_v38 = vmul.f32 1.442695, %v289_v36  ;;  %v287_v39 = vsub.f32 0.0, %v821_v37 }
 0x177   :  { %v579_v40 = vpop.f32.mrf.mxu1 }
 0x178   :  { %647 = vpow2.f32 %v303_v38  ;;  %v299_v41 = vmul.f32 1.442695, %v287_v39  ;;  %v290_v42 = vsub.f32 0.0, %v579_v40 }
 0x179   :  { %v190_v43 = vpop.f32.mrf.mxu1 }
 0x17a   :  { %649 = vpow2.f32 %v299_v41  ;;  %v305_v44 = vmul.f32 1.442695, %v290_v42  ;;  %v288_v45 = vsub.f32 0.0, %v190_v43 }
 0x17b   :  { %v586_v52 = vpop.f32.mrf.mxu1 }
 0x17c   :  { %651 = vpow2.f32 %v305_v44  ;;  %v301_v46 = vmul.f32 1.442695, %v288_v45 }
 0x17d   :  { %v640_v47 = vpop.eup %639  ;;  %v252_v57 = vpop.f32.mrf.mxu1 }
 0x17e   :  { %653 = vpow2.f32 %v301_v46  ;;  %v309_v49 = vadd.f32 1.0, %v640_v47  ;;  %v339_v47 = vld [vmem:[#allocation2] sm:$0xff] }
 0x17f   :  { %v642_v48 = vpop.eup %641  ;;  %v587_v62 = vpop.f32.mrf.mxu1 }
 0x180   :  { %v307_v50 = vadd.f32 1.0, %v642_v48 }
 0x181   :  { %v644_v51 = vpop.eup %643  ;;  %v255_v5 = vpop.f32.mrf.mxu1 }
 0x182   :  { %655 = vrcp.f32 %v307_v50  ;;  %v310_v53 = vadd.f32 1.0, %v644_v51  ;;  %v340_v51 = vld [vmem:[#allocation2 + $0x8] sm:$0xff] }
 0x183   :  { %v646_v54 = vpop.eup %645  ;;  %657 = vrcp.f32 %v309_v49  ;;  %v590_v12 = vpop.f32.mrf.mxu1 }
 0x184   :  { %659 = vrcp.f32 %v310_v53  ;;  %v308_v55 = vadd.f32 1.0, %v646_v54  ;;  %v345_v54 = vld [vmem:[#allocation2 + $0x30] sm:$0xff] }
 0x185   :  { %v648_v56 = vpop.eup %647  ;;  %v268_v21 = vpop.f32.mrf.mxu1 }
 0x186   :  { %661 = vrcp.f32 %v308_v55  ;;  %v313_v59 = vadd.f32 1.0, %v648_v56 }
 0x187   :  { %v650_v58 = vpop.eup %649  ;;  %v591_v35 = vpop.f32.mrf.mxu1 }
 0x188   :  { %v311_v60 = vadd.f32 1.0, %v650_v58 }
 0x189   :  { %v652_v61 = vpop.eup %651  ;;  %v271_v39 = vpop.f32.mrf.mxu1 }
 0x18a   :  { %663 = vrcp.f32 %v311_v60  ;;  %v314_v63 = vadd.f32 1.0, %v652_v61  ;;  %v346_v61 = vld [vmem:[#allocation2 + $0x38] sm:$0xff] }
 0x18b   :  { %v654_v3 = vpop.eup %653  ;;  %665 = vrcp.f32 %v313_v59 }
 0x18c   :  { %667 = vrcp.f32 %v314_v63  ;;  %v312_v4 = vadd.f32 1.0, %v654_v3 }
 0x18e   :  { %669 = vrcp.f32 %v312_v4 }
 0x18f   :  { %v656_v7 = vpop.eup %655 }
 0x190   :  { %v658_v10 = vpop.eup %657  ;;  %v323_v13 = vmul.f32 %v656_v7, %v171_v25 }
 0x191   :  { %v660_v11 = vpop.eup %659  ;;  %v325_v18 = vmul.f32 %v658_v10, %v815_v23 }
 0x192   :  { %v326_v14 = vmul.f32 %v660_v11, %v575_v28  ;;  %v331_v22 = vmul.f32 %v323_v13, %v252_v57  ;;  %v343_v57 = vld [vmem:[#allocation2 + $0x20] sm:$0xff] }
 0x193   :  { %v662_v15 = vpop.eup %661  ;;  %v333_v27 = vmul.f32 %v586_v52, %v325_v18 }
 0x194   :  { %v324_v19 = vmul.f32 %v662_v15, %v174_v31  ;;  %v334_v20 = vmul.f32 %v587_v62, %v326_v14 }
 0x196   :  { %v332_v24 = vmul.f32 %v324_v19, %v255_v5  ;;  %v348_v33 = vpack.c.bf16 %v334_v20, %v333_v27  ;;  %v344_v5 = vld [vmem:[#allocation2 + $0x28] sm:$0xff] }
 0x197   :  { %v664_v26 = vpop.eup %663 }
 0x198   :  { %v666_v29 = vpop.eup %665  ;;  %v347_v30 = vpack.c.bf16 %v332_v24, %v331_v22  ;;  %v327_v36 = vmul.f32 %v664_v26, %v821_v37  ;;  %v341_v37 = vld [vmem:[#allocation2 + $0x10] sm:$0xff] }
 0x199   :  { %v668_v32 = vpop.eup %667  ;;  %v329_v23 = vmul.f32 %v666_v29, %v818_v34  ;;  %v342_v34 = vld [vmem:[#allocation2 + $0x18] sm:$0xff] }
 0x19a   :  { %v330_v25 = vmul.f32 %v668_v32, %v579_v40  ;;  %604 = vmatprep.mubr.msk.bf16.mxu0 %vm399_vm1, %v347_v30  ;;  %v335_v41 = vmul.f32 %v327_v36, %v268_v21 }
 0x19b   :  { %v670_v28 = vpop.eup %669  ;;  %605 = vmatmul.mubr.msk.bf16.vlgmr.msra.gmra.mxu0 %vm399_vm1, %v348_v33  ;;  %v337_v44 = vmul.f32 %v590_v12, %v329_v23 }
 0x19c   :  { %v328_v31 = vmul.f32 %v670_v28, %v190_v43  ;;  %v338_v38 = vmul.f32 %v591_v35, %v330_v25 }
 0x19e   :  { %v336_v42 = vmul.f32 %v328_v31, %v271_v39  ;;  %v350_v46 = vpack.c.bf16 %v338_v38, %v337_v44 }
 0x1a0   :  { %v349_v45 = vpack.c.bf16 %v336_v42, %v335_v41 }
 0x1a2   :  { %608 = vmatprep.mubr.msk.bf16.mxu0 %vm399_vm1, %v349_v45 }
 0x1a3   :  { %609 = vmatmul.mubr.msk.bf16.gmra.mxu0 %vm399_vm1, %v350_v46 }
 0x25b   :  { %v606_v40 = vpop.f32.mrf.mxu0 }
 0x25c   :  { %v479_v48 = vadd.f32 %v606_v40, %v341_v37 }
 0x25d   :  { %v446_v49 = vpop.f32.mrf.mxu0 }
 0x25e   :  { %487 = vst.msk [vmem:[#allocation2 + $0x10] sm:$0xff] %vm22_vm0, %v479_v48  ;;  %v477_v43 = vadd.f32 %v446_v49, %v339_v47 }
 0x25f   :  { %v607_v50 = vpop.f32.mrf.mxu0 }
 0x260   :  { %485 = vst.msk [vmem:[#allocation2] sm:$0xff] %vm22_vm0, %v477_v43  ;;  %v480_v52 = vadd.f32 %v607_v50, %v342_v34 }
 0x261   :  { %v449_v53 = vpop.f32.mrf.mxu0 }
 0x262   :  { %488 = vst.msk [vmem:[#allocation2 + $0x18] sm:$0xff] %vm22_vm0, %v480_v52  ;;  %v478_v55 = vadd.f32 %v449_v53, %v340_v51 }
 0x263   :  { %v610_v56 = vpop.f32.mrf.mxu0 }
 0x264   :  { %486 = vst.msk [vmem:[#allocation2 + $0x8] sm:$0xff] %vm22_vm0, %v478_v55  ;;  %v483_v58 = vadd.f32 %v610_v56, %v345_v54 }
 0x265   :  { %v498_v59 = vld [vmem:[#allocation2 + $0x10] sm:$0xff]  ;;  %v462_v60 = vpop.f32.mrf.mxu0 }
 0x266   :  { %v506_v62 = vadd.f32 %v498_v59, %v700_v0  ;;  %491 = vst.msk [vmem:[#allocation2 + $0x30] sm:$0xff] %vm22_vm0, %v483_v58  ;;  %v481_v63 = vadd.f32 %v462_v60, %v343_v57 }
 0x267   :  { %v496_v3 = vld [vmem:[#allocation2] sm:$0xff]  ;;  %v611_v4 = vpop.f32.mrf.mxu0 }
 0x268   :  { %514 = vst.msk [vmem:[%s883_s4 + $0x10] sm:$0xff] %vm22_vm0, %v506_v62  ;;  %v504_v7 = vadd.f32 %v496_v3, %v705_v1  ;;  %489 = vst.msk [vmem:[#allocation2 + $0x20] sm:$0xff] %vm22_vm0, %v481_v63  ;;  %v484_v10 = vadd.f32 %v611_v4, %v346_v61 }
 0x269   :  { %v499_v11 = vld [vmem:[#allocation2 + $0x18] sm:$0xff]  ;;  %v465_v12 = vpop.f32.mrf.mxu0 }
 0x26a   :  { %512 = vst.msk [vmem:[%s883_s4] sm:$0xff] %vm22_vm0, %v504_v7  ;;  %v507_v0 = vadd.f32 %v499_v11, %v710_v2  ;;  %492 = vst.msk [vmem:[#allocation2 + $0x38] sm:$0xff] %vm22_vm0, %v484_v10  ;;  %v482_v13 = vadd.f32 %v465_v12, %v344_v5 }
 0x26b   :  { %v497_v14 = vld [vmem:[#allocation2 + $0x8] sm:$0xff] }
 0x26c   :  { %515 = vst.msk [vmem:[%s883_s4 + $0x18] sm:$0xff] %vm22_vm0, %v507_v0  ;;  %v505_v1 = vadd.f32 %v497_v14, %v721_v6  ;;  %490 = vst.msk [vmem:[#allocation2 + $0x28] sm:$0xff] %vm22_vm0, %v482_v13 }
 0x26d   :  { %v502_v15 = vld [vmem:[#allocation2 + $0x30] sm:$0xff] }
 0x26e   :  { %513 = vst.msk [vmem:[%s883_s4 + $0x8] sm:$0xff] %vm22_vm0, %v505_v1  ;;  %v510_v2 = vadd.f32 %v502_v15, %v751_v17 }
 0x26f   :  { %v500_v18 = vld [vmem:[#allocation2 + $0x20] sm:$0xff] }
 0x270   :  { %518 = vst.msk [vmem:[%s883_s4 + $0x30] sm:$0xff] %vm22_vm0, %v510_v2  ;;  %v508_v19 = vadd.f32 %v500_v18, %v733_v9 }
 0x271   :  { %v503_v20 = vld [vmem:[#allocation2 + $0x38] sm:$0xff] }
 0x272   :  { %516 = vst.msk [vmem:[%s883_s4 + $0x20] sm:$0xff] %vm22_vm0, %v508_v19  ;;  %v511_v6 = vadd.f32 %v503_v20, %v746_v16 }
 0x273   :  { %v501_v21 = vld [vmem:[#allocation2 + $0x28] sm:$0xff] }
 0x274   :  { %519 = vst.msk [vmem:[%s883_s4 + $0x38] sm:$0xff] %vm22_vm0, %v511_v6  ;;  %v509_v17 = vadd.f32 %v501_v21, %v728_v8 }
 0x276   :  { %517 = vst.msk [vmem:[%s883_s4 + $0x28] sm:$0xff] %vm22_vm0, %v509_v17 }

</bundles_post_ra>
